<compile_context>
chip_gen: v7x
topology: tpu7x:2x2x1
jax: 0.10.0
libtpu: 0.0.40
codegen_flags: <defaults>
</compile_context>

<pallas_src>
import math

import jax
import jax.numpy as jnp
from jax import lax
from jax.experimental import pallas as pl
from jax.experimental.pallas import tpu as pltpu

# ----------------------------- configuration -------------------------------
B = 2                        # batch
LQ = 8                       # query length (words)
LC = 16                      # context length (words)
WCH = 10                     # chars per word
NUM_CHAR = 40                # char vocab
VOCAB = 50                   # (synthetic) word vocab
DIM_CHAR = 20                # char embedding dim   (module default)
DIM_GLOVE = 50               # word embedding dim   (module default)
D0 = DIM_CHAR + DIM_GLOVE    # 70, highway dim
D0P = 128                    # highway dim zero-padded to one 128-lane group
KCC = 5                      # char conv kernel width, Conv2d (1, 5)
WO = WCH - KCC + 1           # char conv output width
OUT_DIM = 400                # version 'v1' head width
OUT2P = 896                  # start|end (800) padded to 7*128 lanes
NW = B * (LQ + LC)           # total words in the fused slab (q rows, then c rows)

CHART_OFF = 56                            # row offset of fused char tables (8-aligned)
TBL_ROWS = CHART_OFF + KCC * NUM_CHAR     # 256
TBL_COLS = 64                             # >= max(DIM_GLOVE, DIM_CHAR)


# ------------------------------ fused kernel --------------------------------
def fused_kernel(idx_ref, tbl_ref, hw_ref, headw_ref, bias_ref, out_ref):
    f32, bf16 = jnp.float32, jnp.bfloat16

    idx = idx_ref[...]        # [NW, 1+WCH] int32 : col 0 word idx, cols 1: char idx
    tbl = tbl_ref[...]        # [TBL_ROWS, TBL_COLS] bf16 : glove + fused char tables
    hw = hw_ref[...]          # [2*D0P, 2*D0P] bf16 : two highway layers (linear|gate)
    bias = bias_ref[...]      # [8, OUT2P] f32 : row0 conv, rows1-2 highway, row3 heads

    # --- word embedding: one-hot @ glove (MXU gather) ------------------------
    woh = (lax.broadcasted_iota(jnp.int32, (NW, VOCAB), 1)
           == idx[:, 0:1]).astype(bf16)                       # [NW, VOCAB]
    glove = tbl[0:VOCAB, 0:DIM_GLOVE]                         # [VOCAB, 50]
    wemb = jnp.dot(woh, glove, preferred_element_type=f32)    # [NW, 50]

    # --- char embedding + (1,5) conv, fused via pre-folded tables ------------
    # one-hot of char at position p, stacked position-major: rows p*NW + n
    iota_c = lax.broadcasted_iota(jnp.int32, (NW, NUM_CHAR), 1)
    oh_all = jnp.concatenate(
        [(iota_c == idx[:, 1 + p:2 + p]).astype(bf16) for p in range(WCH)],
        axis=0)                                               # [WCH*NW, NUM_CHAR]

    # conv output y[w*NW+n, :] = b + sum_k (charTable @ Wconv_k)[cidx[n, w+k], :]
    y = jnp.zeros((WO * NW, DIM_CHAR), f32) + bias[0:1, 0:DIM_CHAR]
    for k in range(KCC):
        t_k = tbl[CHART_OFF + k * NUM_CHAR:CHART_OFF + (k + 1) * NUM_CHAR,
                  0:DIM_CHAR]                                 # [NUM_CHAR, 20]
        y = y + jnp.dot(oh_all[k * NW:(k + WO) * NW, :], t_k,
                        preferred_element_type=f32)
    y = jnp.maximum(y, 0.0)

    # max over the WO conv positions; NW % 8 == 0 so slices are sublane-aligned
    char_pooled = y[0:NW, :]
    for w in range(1, WO):
        char_pooled = jnp.maximum(char_pooled, y[w * NW:(w + 1) * NW, :])

    # --- cat(wordEmbed, charEmbed), zero-padded to one 128-lane group --------
    x = jnp.concatenate(
        [wemb, char_pooled, jnp.zeros((NW, D0P - D0), f32)], axis=1)  # [NW, 128]

    # --- HighwayNetwork (2 layers), lane-group aligned linear|gate halves ----
    for layer in range(2):
        w = hw[layer * D0P:(layer + 1) * D0P, :]              # [128, 256]
        b = bias[1 + layer:2 + layer, 0:2 * D0P]               # [1, 256]
        z = jnp.dot(x.astype(bf16), w, preferred_element_type=f32) + b
        H = jnp.maximum(z[:, 0:D0P], 0.0)                      # relu(linear(x))
        T = jax.nn.sigmoid(z[:, D0P:2 * D0P])                  # sigmoid(gate(x))
        x = T * H + (1.0 - T) * x                              # padded lanes stay 0

    # --- mean over seq (q / c separately): iota-built pooling matmul ---------
    row = lax.broadcasted_iota(jnp.int32, (2 * B, NW), 0)
    col = lax.broadcasted_iota(jnp.int32, (2 * B, NW), 1)
    qsel = (row < B) & (col >= row * LQ) & (col < (row + 1) * LQ)
    csel = (row >= B) & (col >= B * LQ + (row - B) * LC) \
                      & (col < B * LQ + (row - B + 1) * LC)
    pool = (qsel.astype(f32) / LQ + csel.astype(f32) / LC).astype(bf16)
    pooled = jnp.dot(pool, x.astype(bf16), preferred_element_type=f32)  # [2B, 128]

    # emb = cat(mean(emb_q), mean(emb_c)) per batch, padded layout [B, 256]
    emb = jnp.concatenate([pooled[0:B, :], pooled[B:2 * B, :]], axis=1)

    # --- merged start|end heads: one depth-256 matmul, lane-dense output -----
    logits = jnp.dot(emb.astype(bf16), headw_ref[...],
                     preferred_element_type=f32) + bias[3:4, :]         # [B, 896]
    out_ref[...] = logits


def fused_forward_call(idx, p):
    def full(shape):
        return pl.BlockSpec(shape, lambda i: (0,) * len(shape))

    return pl.pallas_call(
        fused_kernel,
        out_shape=jax.ShapeDtypeStruct((B, OUT2P), jnp.float32),
        grid=(1,),
        in_specs=[
            full((NW, 1 + WCH)),          # int32 word|char index slab
            full((TBL_ROWS, TBL_COLS)),   # glove table + fused char-conv tables
            full((2 * D0P, 2 * D0P)),     # highway layers 1+2 (linear|gate)
            full((2 * D0P, OUT2P)),       # merged start|end head weight
            full((8, OUT2P)),             # all biases, one sublane row each
        ],
        out_specs=full((B, OUT2P)),
        compiler_params=pltpu.CompilerParams(
            dimension_semantics=("arbitrary",)),
    )(idx, p["tbl"], p["hw_w"], p["head_w"], p["bias"])


# ------------------------------ parameters ----------------------------------
def make_params(key):
    keys = iter(jax.random.split(key, 32))

    def rnd(shape, fan_in):
        return (jax.random.normal(next(keys), shape, jnp.float32)
                / math.sqrt(max(fan_in, 1)))

    raw = {}
    raw["char_table"] = rnd((NUM_CHAR, DIM_CHAR), 10)
    # TODO(synk): pretrained GloVe vectors replaced by a deterministic random table.
    raw["glove_table"] = rnd((VOCAB, DIM_GLOVE), 10)
    # Conv2d(dimChar, dimChar, (1,5)) as per-tap [Cin, Cout] blocks + bias.
    raw["conv_w"] = rnd((KCC * DIM_CHAR, DIM_CHAR), KCC * DIM_CHAR)
    raw["conv_b"] = rnd((DIM_CHAR,), KCC * DIM_CHAR)
    raw["hw_wl"] = [rnd((D0, D0), D0) for _ in range(2)]
    raw["hw_wg"] = [rnd((D0, D0), D0) for _ in range(2)]
    raw["hw_bl"] = [rnd((D0,), D0) for _ in range(2)]
    raw["hw_bg"] = [rnd((D0,), D0) for _ in range(2)]
    raw["ws"] = rnd((2 * D0, OUT_DIM), 2 * D0)     # start head, pre-transposed
    raw["we"] = rnd((2 * D0, OUT_DIM), 2 * D0)     # end head, pre-transposed
    raw["bs"] = rnd((OUT_DIM,), 2 * D0)
    raw["be"] = rnd((OUT_DIM,), 2 * D0)

    bf16 = jnp.bfloat16
    packed = {}

    # Embedding tables slab: glove at rows [0:VOCAB], fused char-conv tables
    # T_k = charTable @ Wconv_k at rows [CHART_OFF + k*NUM_CHAR : ...].
    tbl = jnp.zeros((TBL_ROWS, TBL_COLS), jnp.float32)
    tbl = tbl.at[0:VOCAB, 0:DIM_GLOVE].set(raw["glove_table"])
    for k in range(KCC):
        t_k = raw["char_table"] @ raw["conv_w"][k * DIM_CHAR:(k + 1) * DIM_CHAR]
        tbl = tbl.at[CHART_OFF + k * NUM_CHAR:CHART_OFF + (k + 1) * NUM_CHAR,
                     0:DIM_CHAR].set(t_k)
    packed["tbl"] = tbl.astype(bf16)

    # Highway slab [2*D0P, 2*D0P]: per layer, linear in cols [0:D0] of the first
    # 128-lane group, gate in cols [D0P:D0P+D0]; all padding zero.
    hw = jnp.zeros((2 * D0P, 2 * D0P), jnp.float32)
    for l in range(2):
        hw = hw.at[l * D0P:l * D0P + D0, 0:D0].set(raw["hw_wl"][l])
        hw = hw.at[l * D0P:l * D0P + D0, D0P:D0P + D0].set(raw["hw_wg"][l])
    packed["hw_w"] = hw.astype(bf16)

    # Merged head slab [2*D0P, OUT2P]: rows [0:D0] = q half, rows [D0P:D0P+D0] =
    # c half; cols [0:OUT] = start, [OUT:2*OUT] = end, rest zero padding.
    hd = jnp.zeros((2 * D0P, OUT2P), jnp.float32)
    hd = hd.at[0:D0, 0:OUT_DIM].set(raw["ws"][0:D0])
    hd = hd.at[0:D0, OUT_DIM:2 * OUT_DIM].set(raw["we"][0:D0])
    hd = hd.at[D0P:D0P + D0, 0:OUT_DIM].set(raw["ws"][D0:2 * D0])
    hd = hd.at[D0P:D0P + D0, OUT_DIM:2 * OUT_DIM].set(raw["we"][D0:2 * D0])
    packed["head_w"] = hd.astype(bf16)

    # Bias slab [8, OUT2P] f32, one bias per sublane row.
    bias = jnp.zeros((8, OUT2P), jnp.float32)
    bias = bias.at[0, 0:DIM_CHAR].set(raw["conv_b"])
    for l in range(2):
        bias = bias.at[1 + l, 0:D0].set(raw["hw_bl"][l])
        bias = bias.at[1 + l, D0P:D0P + D0].set(raw["hw_bg"][l])
    bias = bias.at[3, 0:OUT_DIM].set(raw["bs"])
    bias = bias.at[3, OUT_DIM:2 * OUT_DIM].set(raw["be"])
    packed["bias"] = bias

    return raw, packed


# ------------------------------ model forward --------------------------------
def forward(packed, q_word, q_char, c_word, c_char):
    # Only tiny int32 index plumbing stays in the wrapper.
    widx = jnp.concatenate([q_word.reshape(-1), c_word.reshape(-1)]).astype(jnp.int32)
    cidx = jnp.concatenate([q_char.reshape(-1, WCH),
                            c_char.reshape(-1, WCH)], axis=0).astype(jnp.int32)
    idx = jnp.concatenate([widx[:, None], cidx], axis=1)        # [NW, 1+WCH]
    logits = fused_forward_call(idx, packed)
    return logits[:, 0:OUT_DIM], logits[:, OUT_DIM:2 * OUT_DIM]


# -------------------- pure-JAX f32 reference (for checking) ------------------
def reference_forward(raw, q_word, q_char, c_word, c_char):
    def input_embed(word_idx, char_idx):
        ce = raw["char_table"][char_idx]                       # [B, L, WCH, Cc]
        conv = []
        for w in range(WO):
            acc = raw["conv_b"]
            for k in range(KCC):
                acc = acc + ce[:, :, w + k, :] @ raw["conv_w"][k * DIM_CHAR:
                                                               (k + 1) * DIM_CHAR]
            conv.append(jnp.maximum(acc, 0.0))
        char_emb = jnp.stack(conv, axis=2).max(axis=2)         # [B, L, Cc]
        we = raw["glove_table"][word_idx]                      # [B, L, Dg]
        x = jnp.concatenate([we, char_emb], axis=-1)           # [B, L, 70]
        for l in range(2):
            H = jnp.maximum(x @ raw["hw_wl"][l] + raw["hw_bl"][l], 0.0)
            T = jax.nn.sigmoid(x @ raw["hw_wg"][l] + raw["hw_bg"][l])
            x = T * H + (1.0 - T) * x
        return x

    eq = input_embed(q_word, q_char).mean(axis=1)
    ec = input_embed(c_word, c_char).mean(axis=1)
    emb = jnp.concatenate([eq, ec], axis=-1)
    return emb @ raw["ws"] + raw["bs"], emb @ raw["we"] + raw["be"]


# ---------------------------------- main -------------------------------------
if __name__ == "__main__":
    key = jax.random.PRNGKey(0)
    kp, k1, k2, k3, k4 = jax.random.split(key, 5)
    raw, packed = make_params(kp)

    # q = {'wordIdx': [B, LQ], 'charIdx': [B, LQ, WCH]}, c analogously.
    q_word = jax.random.randint(k1, (B, LQ), 0, VOCAB)
    q_char = jax.random.randint(k2, (B, LQ, WCH), 0, NUM_CHAR)
    c_word = jax.random.randint(k3, (B, LC), 0, VOCAB)
    c_char = jax.random.randint(k4, (B, LC, WCH), 0, NUM_CHAR)

    start, end = jax.jit(forward)(packed, q_word, q_char, c_word, c_char)
    jax.block_until_ready((start, end))
    assert start.shape == (B, OUT_DIM) and end.shape == (B, OUT_DIM)

    # correctness check vs. pure-JAX f32 reference (bf16 matmul tolerance)
    start_ref, end_ref = reference_forward(raw, q_word, q_char, c_word, c_char)
    err = max(float(jnp.max(jnp.abs(start - start_ref))),
              float(jnp.max(jnp.abs(end - end_ref))))
    assert err < 1e-1, f"mismatch vs f32 reference: max abs err = {err}"

    print("KERNEL_OK")
</pallas_src>

<mosaic_0001>
module attributes {stable_mosaic.version = 11 : i64} {
  func.func @fused_kernel(%arg0: i32, %arg1: memref<48x11xi32, #tpu.memory_space<vmem>>, %arg2: memref<256x64xbf16, #tpu.memory_space<vmem>>, %arg3: memref<256x256xbf16, #tpu.memory_space<vmem>>, %arg4: memref<256x896xbf16, #tpu.memory_space<vmem>>, %arg5: memref<8x896xf32, #tpu.memory_space<vmem>>, %arg6: memref<2x896xf32, #tpu.memory_space<vmem>>) attributes {dimension_semantics = [#tpu.dimension_semantics<arbitrary>], iteration_bounds = array<i64: 1>, scalar_prefetch = 0 : i64, scratch_operands = 0 : i64, tpu.core_type = #tpu.core_type<tc>, window_params = [{pipeline_mode = #tpu.pipeline_mode<synchronous>, transform_indices = @transform_0, window_bounds = array<i64: 48, 11>}, {pipeline_mode = #tpu.pipeline_mode<synchronous>, transform_indices = @transform_1, window_bounds = array<i64: 256, 64>}, {pipeline_mode = #tpu.pipeline_mode<synchronous>, transform_indices = @transform_2, window_bounds = array<i64: 256, 256>}, {pipeline_mode = #tpu.pipeline_mode<synchronous>, transform_indices = @transform_3, window_bounds = array<i64: 256, 896>}, {pipeline_mode = #tpu.pipeline_mode<synchronous>, transform_indices = @transform_4, window_bounds = array<i64: 8, 896>}, {pipeline_mode = #tpu.pipeline_mode<synchronous>, transform_indices = @transform_5, window_bounds = array<i64: 2, 896>}]} {
    %c0 = arith.constant 0 : index
    %c0_0 = arith.constant 0 : index
    %0 = vector.load %arg1[%c0, %c0_0] : memref<48x11xi32, #tpu.memory_space<vmem>>, vector<48x11xi32>
    %c0_1 = arith.constant 0 : index
    %c0_2 = arith.constant 0 : index
    %1 = vector.load %arg2[%c0_1, %c0_2] : memref<256x64xbf16, #tpu.memory_space<vmem>>, vector<256x64xbf16>
    %c0_3 = arith.constant 0 : index
    %c0_4 = arith.constant 0 : index
    %2 = vector.load %arg3[%c0_3, %c0_4] : memref<256x256xbf16, #tpu.memory_space<vmem>>, vector<256x256xbf16>
    %c0_5 = arith.constant 0 : index
    %c0_6 = arith.constant 0 : index
    %3 = vector.load %arg5[%c0_5, %c0_6] : memref<8x896xf32, #tpu.memory_space<vmem>>, vector<8x896xf32>
    %4 = tpu.iota {dimensions = array<i32: 1>} : vector<48x50xi32>
    %5 = vector.extract_strided_slice %0 {offsets = [0, 0], sizes = [48, 1], strides = [1, 1]} : vector<48x11xi32> to vector<48x1xi32>
    %6 = vector.broadcast %5 : vector<48x1xi32> to vector<48x50xi32>
    %7 = arith.cmpi eq, %4, %6 : vector<48x50xi32>
    %8 = arith.extui %7 : vector<48x50xi1> to vector<48x50xi32>
    %9 = arith.sitofp %8 : vector<48x50xi32> to vector<48x50xf32>
    %10 = arith.truncf %9 : vector<48x50xf32> to vector<48x50xbf16>
    %11 = vector.extract_strided_slice %1 {offsets = [0, 0], sizes = [50, 50], strides = [1, 1]} : vector<256x64xbf16> to vector<50x50xbf16>
    %cst = arith.constant dense<0.000000e+00> : vector<48x50xf32>
    %12 = tpu.matmul %10, %11, %cst {dimension_numbers = #tpu.dot_dimension_numbers<[1], [0], [0], [1], [0, 0, 1, 1], [], []>} : vector<48x50xbf16>, vector<50x50xbf16>, vector<48x50xf32> -> vector<48x50xf32>
    %13 = tpu.iota {dimensions = array<i32: 1>} : vector<48x40xi32>
    %14 = vector.extract_strided_slice %0 {offsets = [0, 1], sizes = [48, 1], strides = [1, 1]} : vector<48x11xi32> to vector<48x1xi32>
    %15 = vector.broadcast %14 : vector<48x1xi32> to vector<48x40xi32>
    %16 = arith.cmpi eq, %13, %15 : vector<48x40xi32>
    %17 = arith.extui %16 : vector<48x40xi1> to vector<48x40xi32>
    %18 = arith.sitofp %17 : vector<48x40xi32> to vector<48x40xf32>
    %19 = arith.truncf %18 : vector<48x40xf32> to vector<48x40xbf16>
    %20 = vector.extract_strided_slice %0 {offsets = [0, 2], sizes = [48, 1], strides = [1, 1]} : vector<48x11xi32> to vector<48x1xi32>
    %21 = vector.broadcast %20 : vector<48x1xi32> to vector<48x40xi32>
    %22 = arith.cmpi eq, %13, %21 : vector<48x40xi32>
    %23 = arith.extui %22 : vector<48x40xi1> to vector<48x40xi32>
    %24 = arith.sitofp %23 : vector<48x40xi32> to vector<48x40xf32>
    %25 = arith.truncf %24 : vector<48x40xf32> to vector<48x40xbf16>
    %26 = vector.extract_strided_slice %0 {offsets = [0, 3], sizes = [48, 1], strides = [1, 1]} : vector<48x11xi32> to vector<48x1xi32>
    %27 = vector.broadcast %26 : vector<48x1xi32> to vector<48x40xi32>
    %28 = arith.cmpi eq, %13, %27 : vector<48x40xi32>
    %29 = arith.extui %28 : vector<48x40xi1> to vector<48x40xi32>
    %30 = arith.sitofp %29 : vector<48x40xi32> to vector<48x40xf32>
    %31 = arith.truncf %30 : vector<48x40xf32> to vector<48x40xbf16>
    %32 = vector.extract_strided_slice %0 {offsets = [0, 4], sizes = [48, 1], strides = [1, 1]} : vector<48x11xi32> to vector<48x1xi32>
    %33 = vector.broadcast %32 : vector<48x1xi32> to vector<48x40xi32>
    %34 = arith.cmpi eq, %13, %33 : vector<48x40xi32>
    %35 = arith.extui %34 : vector<48x40xi1> to vector<48x40xi32>
    %36 = arith.sitofp %35 : vector<48x40xi32> to vector<48x40xf32>
    %37 = arith.truncf %36 : vector<48x40xf32> to vector<48x40xbf16>
    %38 = vector.extract_strided_slice %0 {offsets = [0, 5], sizes = [48, 1], strides = [1, 1]} : vector<48x11xi32> to vector<48x1xi32>
    %39 = vector.broadcast %38 : vector<48x1xi32> to vector<48x40xi32>
    %40 = arith.cmpi eq, %13, %39 : vector<48x40xi32>
    %41 = arith.extui %40 : vector<48x40xi1> to vector<48x40xi32>
    %42 = arith.sitofp %41 : vector<48x40xi32> to vector<48x40xf32>
    %43 = arith.truncf %42 : vector<48x40xf32> to vector<48x40xbf16>
    %44 = vector.extract_strided_slice %0 {offsets = [0, 6], sizes = [48, 1], strides = [1, 1]} : vector<48x11xi32> to vector<48x1xi32>
    %45 = vector.broadcast %44 : vector<48x1xi32> to vector<48x40xi32>
    %46 = arith.cmpi eq, %13, %45 : vector<48x40xi32>
    %47 = arith.extui %46 : vector<48x40xi1> to vector<48x40xi32>
    %48 = arith.sitofp %47 : vector<48x40xi32> to vector<48x40xf32>
    %49 = arith.truncf %48 : vector<48x40xf32> to vector<48x40xbf16>
    %50 = vector.extract_strided_slice %0 {offsets = [0, 7], sizes = [48, 1], strides = [1, 1]} : vector<48x11xi32> to vector<48x1xi32>
    %51 = vector.broadcast %50 : vector<48x1xi32> to vector<48x40xi32>
    %52 = arith.cmpi eq, %13, %51 : vector<48x40xi32>
    %53 = arith.extui %52 : vector<48x40xi1> to vector<48x40xi32>
    %54 = arith.sitofp %53 : vector<48x40xi32> to vector<48x40xf32>
    %55 = arith.truncf %54 : vector<48x40xf32> to vector<48x40xbf16>
    %56 = vector.extract_strided_slice %0 {offsets = [0, 8], sizes = [48, 1], strides = [1, 1]} : vector<48x11xi32> to vector<48x1xi32>
    %57 = vector.broadcast %56 : vector<48x1xi32> to vector<48x40xi32>
    %58 = arith.cmpi eq, %13, %57 : vector<48x40xi32>
    %59 = arith.extui %58 : vector<48x40xi1> to vector<48x40xi32>
    %60 = arith.sitofp %59 : vector<48x40xi32> to vector<48x40xf32>
    %61 = arith.truncf %60 : vector<48x40xf32> to vector<48x40xbf16>
    %62 = vector.extract_strided_slice %0 {offsets = [0, 9], sizes = [48, 1], strides = [1, 1]} : vector<48x11xi32> to vector<48x1xi32>
    %63 = vector.broadcast %62 : vector<48x1xi32> to vector<48x40xi32>
    %64 = arith.cmpi eq, %13, %63 : vector<48x40xi32>
    %65 = arith.extui %64 : vector<48x40xi1> to vector<48x40xi32>
    %66 = arith.sitofp %65 : vector<48x40xi32> to vector<48x40xf32>
    %67 = arith.truncf %66 : vector<48x40xf32> to vector<48x40xbf16>
    %68 = vector.extract_strided_slice %0 {offsets = [0, 10], sizes = [48, 1], strides = [1, 1]} : vector<48x11xi32> to vector<48x1xi32>
    %69 = vector.broadcast %68 : vector<48x1xi32> to vector<48x40xi32>
    %70 = arith.cmpi eq, %13, %69 : vector<48x40xi32>
    %71 = arith.extui %70 : vector<48x40xi1> to vector<48x40xi32>
    %72 = arith.sitofp %71 : vector<48x40xi32> to vector<48x40xf32>
    %73 = arith.truncf %72 : vector<48x40xf32> to vector<48x40xbf16>
    %74 = tpu.concatenate %19, %25, %31, %37, %43, %49, %55, %61, %67, %73 in 0 : vector<48x40xbf16>, vector<48x40xbf16>, vector<48x40xbf16>, vector<48x40xbf16>, vector<48x40xbf16>, vector<48x40xbf16>, vector<48x40xbf16>, vector<48x40xbf16>, vector<48x40xbf16>, vector<48x40xbf16> -> vector<480x40xbf16>
    %cst_7 = arith.constant 0.000000e+00 : f32
    %75 = vector.broadcast %cst_7 : f32 to vector<288x20xf32>
    %76 = vector.extract_strided_slice %3 {offsets = [0, 0], sizes = [1, 20], strides = [1, 1]} : vector<8x896xf32> to vector<1x20xf32>
    %77 = vector.broadcast %76 : vector<1x20xf32> to vector<288x20xf32>
    %78 = arith.addf %75, %77 : vector<288x20xf32>
    %79 = vector.extract_strided_slice %1 {offsets = [56, 0], sizes = [40, 20], strides = [1, 1]} : vector<256x64xbf16> to vector<40x20xbf16>
    %80 = vector.extract_strided_slice %74 {offsets = [0, 0], sizes = [288, 40], strides = [1, 1]} : vector<480x40xbf16> to vector<288x40xbf16>
    %cst_8 = arith.constant dense<0.000000e+00> : vector<288x20xf32>
    %81 = tpu.matmul %80, %79, %cst_8 {dimension_numbers = #tpu.dot_dimension_numbers<[1], [0], [0], [1], [0, 0, 1, 1], [], []>} : vector<288x40xbf16>, vector<40x20xbf16>, vector<288x20xf32> -> vector<288x20xf32>
    %82 = arith.addf %78, %81 : vector<288x20xf32>
    %83 = vector.extract_strided_slice %1 {offsets = [96, 0], sizes = [40, 20], strides = [1, 1]} : vector<256x64xbf16> to vector<40x20xbf16>
    %84 = vector.extract_strided_slice %74 {offsets = [48, 0], sizes = [288, 40], strides = [1, 1]} : vector<480x40xbf16> to vector<288x40xbf16>
    %cst_9 = arith.constant dense<0.000000e+00> : vector<288x20xf32>
    %85 = tpu.matmul %84, %83, %cst_9 {dimension_numbers = #tpu.dot_dimension_numbers<[1], [0], [0], [1], [0, 0, 1, 1], [], []>} : vector<288x40xbf16>, vector<40x20xbf16>, vector<288x20xf32> -> vector<288x20xf32>
    %86 = arith.addf %82, %85 : vector<288x20xf32>
    %87 = vector.extract_strided_slice %1 {offsets = [136, 0], sizes = [40, 20], strides = [1, 1]} : vector<256x64xbf16> to vector<40x20xbf16>
    %88 = vector.extract_strided_slice %74 {offsets = [96, 0], sizes = [288, 40], strides = [1, 1]} : vector<480x40xbf16> to vector<288x40xbf16>
    %cst_10 = arith.constant dense<0.000000e+00> : vector<288x20xf32>
    %89 = tpu.matmul %88, %87, %cst_10 {dimension_numbers = #tpu.dot_dimension_numbers<[1], [0], [0], [1], [0, 0, 1, 1], [], []>} : vector<288x40xbf16>, vector<40x20xbf16>, vector<288x20xf32> -> vector<288x20xf32>
    %90 = arith.addf %86, %89 : vector<288x20xf32>
    %91 = vector.extract_strided_slice %1 {offsets = [176, 0], sizes = [40, 20], strides = [1, 1]} : vector<256x64xbf16> to vector<40x20xbf16>
    %92 = vector.extract_strided_slice %74 {offsets = [144, 0], sizes = [288, 40], strides = [1, 1]} : vector<480x40xbf16> to vector<288x40xbf16>
    %cst_11 = arith.constant dense<0.000000e+00> : vector<288x20xf32>
    %93 = tpu.matmul %92, %91, %cst_11 {dimension_numbers = #tpu.dot_dimension_numbers<[1], [0], [0], [1], [0, 0, 1, 1], [], []>} : vector<288x40xbf16>, vector<40x20xbf16>, vector<288x20xf32> -> vector<288x20xf32>
    %94 = arith.addf %90, %93 : vector<288x20xf32>
    %95 = vector.extract_strided_slice %1 {offsets = [216, 0], sizes = [40, 20], strides = [1, 1]} : vector<256x64xbf16> to vector<40x20xbf16>
    %96 = vector.extract_strided_slice %74 {offsets = [192, 0], sizes = [288, 40], strides = [1, 1]} : vector<480x40xbf16> to vector<288x40xbf16>
    %cst_12 = arith.constant dense<0.000000e+00> : vector<288x20xf32>
    %97 = tpu.matmul %96, %95, %cst_12 {dimension_numbers = #tpu.dot_dimension_numbers<[1], [0], [0], [1], [0, 0, 1, 1], [], []>} : vector<288x40xbf16>, vector<40x20xbf16>, vector<288x20xf32> -> vector<288x20xf32>
    %98 = arith.addf %94, %97 : vector<288x20xf32>
    %cst_13 = arith.constant 0.000000e+00 : f32
    %99 = vector.broadcast %cst_13 : f32 to vector<288x20xf32>
    %100 = arith.maximumf %98, %99 : vector<288x20xf32>
    %101 = vector.extract_strided_slice %100 {offsets = [0, 0], sizes = [48, 20], strides = [1, 1]} : vector<288x20xf32> to vector<48x20xf32>
    %102 = vector.extract_strided_slice %100 {offsets = [48, 0], sizes = [48, 20], strides = [1, 1]} : vector<288x20xf32> to vector<48x20xf32>
    %103 = arith.maximumf %101, %102 : vector<48x20xf32>
    %104 = vector.extract_strided_slice %100 {offsets = [96, 0], sizes = [48, 20], strides = [1, 1]} : vector<288x20xf32> to vector<48x20xf32>
    %105 = arith.maximumf %103, %104 : vector<48x20xf32>
    %106 = vector.extract_strided_slice %100 {offsets = [144, 0], sizes = [48, 20], strides = [1, 1]} : vector<288x20xf32> to vector<48x20xf32>
    %107 = arith.maximumf %105, %106 : vector<48x20xf32>
    %108 = vector.extract_strided_slice %100 {offsets = [192, 0], sizes = [48, 20], strides = [1, 1]} : vector<288x20xf32> to vector<48x20xf32>
    %109 = arith.maximumf %107, %108 : vector<48x20xf32>
    %110 = vector.extract_strided_slice %100 {offsets = [240, 0], sizes = [48, 20], strides = [1, 1]} : vector<288x20xf32> to vector<48x20xf32>
    %111 = arith.maximumf %109, %110 : vector<48x20xf32>
    %cst_14 = arith.constant 0.000000e+00 : f32
    %112 = vector.broadcast %cst_14 : f32 to vector<48x58xf32>
    %113 = tpu.concatenate %12, %111, %112 in 1 : vector<48x50xf32>, vector<48x20xf32>, vector<48x58xf32> -> vector<48x128xf32>
    %114 = vector.extract_strided_slice %2 {offsets = [0, 0], sizes = [128, 256], strides = [1, 1]} : vector<256x256xbf16> to vector<128x256xbf16>
    %115 = vector.extract_strided_slice %3 {offsets = [1, 0], sizes = [1, 256], strides = [1, 1]} : vector<8x896xf32> to vector<1x256xf32>
    %116 = arith.truncf %113 : vector<48x128xf32> to vector<48x128xbf16>
    %cst_15 = arith.constant dense<0.000000e+00> : vector<48x256xf32>
    %117 = tpu.matmul %116, %114, %cst_15 {dimension_numbers = #tpu.dot_dimension_numbers<[1], [0], [0], [1], [0, 0, 1, 1], [], []>} : vector<48x128xbf16>, vector<128x256xbf16>, vector<48x256xf32> -> vector<48x256xf32>
    %118 = vector.broadcast %115 : vector<1x256xf32> to vector<48x256xf32>
    %119 = arith.addf %117, %118 : vector<48x256xf32>
    %120 = vector.extract_strided_slice %119 {offsets = [0, 0], sizes = [48, 128], strides = [1, 1]} : vector<48x256xf32> to vector<48x128xf32>
    %cst_16 = arith.constant 0.000000e+00 : f32
    %121 = vector.broadcast %cst_16 : f32 to vector<48x128xf32>
    %122 = arith.maximumf %120, %121 : vector<48x128xf32>
    %123 = vector.extract_strided_slice %119 {offsets = [0, 128], sizes = [48, 128], strides = [1, 1]} : vector<48x256xf32> to vector<48x128xf32>
    %124 = arith.negf %123 : vector<48x128xf32>
    %125 = math.exp %124 : vector<48x128xf32>
    %cst_17 = arith.constant 1.000000e+00 : f32
    %126 = vector.broadcast %cst_17 : f32 to vector<48x128xf32>
    %127 = arith.addf %126, %125 : vector<48x128xf32>
    %128 = arith.divf %126, %127 : vector<48x128xf32>
    %129 = arith.mulf %128, %122 : vector<48x128xf32>
    %cst_18 = arith.constant 1.000000e+00 : f32
    %130 = vector.broadcast %cst_18 : f32 to vector<48x128xf32>
    %131 = arith.subf %130, %128 : vector<48x128xf32>
    %132 = arith.mulf %131, %113 : vector<48x128xf32>
    %133 = arith.addf %129, %132 : vector<48x128xf32>
    %134 = vector.extract_strided_slice %2 {offsets = [128, 0], sizes = [128, 256], strides = [1, 1]} : vector<256x256xbf16> to vector<128x256xbf16>
    %135 = vector.extract_strided_slice %3 {offsets = [2, 0], sizes = [1, 256], strides = [1, 1]} : vector<8x896xf32> to vector<1x256xf32>
    %136 = arith.truncf %133 : vector<48x128xf32> to vector<48x128xbf16>
    %cst_19 = arith.constant dense<0.000000e+00> : vector<48x256xf32>
    %137 = tpu.matmul %136, %134, %cst_19 {dimension_numbers = #tpu.dot_dimension_numbers<[1], [0], [0], [1], [0, 0, 1, 1], [], []>} : vector<48x128xbf16>, vector<128x256xbf16>, vector<48x256xf32> -> vector<48x256xf32>
    %138 = vector.broadcast %135 : vector<1x256xf32> to vector<48x256xf32>
    %139 = arith.addf %137, %138 : vector<48x256xf32>
    %140 = vector.extract_strided_slice %139 {offsets = [0, 0], sizes = [48, 128], strides = [1, 1]} : vector<48x256xf32> to vector<48x128xf32>
    %cst_20 = arith.constant 0.000000e+00 : f32
    %141 = vector.broadcast %cst_20 : f32 to vector<48x128xf32>
    %142 = arith.maximumf %140, %141 : vector<48x128xf32>
    %143 = vector.extract_strided_slice %139 {offsets = [0, 128], sizes = [48, 128], strides = [1, 1]} : vector<48x256xf32> to vector<48x128xf32>
    %144 = arith.negf %143 : vector<48x128xf32>
    %145 = math.exp %144 : vector<48x128xf32>
    %cst_21 = arith.constant 1.000000e+00 : f32
    %146 = vector.broadcast %cst_21 : f32 to vector<48x128xf32>
    %147 = arith.addf %146, %145 : vector<48x128xf32>
    %148 = arith.divf %146, %147 : vector<48x128xf32>
    %149 = arith.mulf %148, %142 : vector<48x128xf32>
    %cst_22 = arith.constant 1.000000e+00 : f32
    %150 = vector.broadcast %cst_22 : f32 to vector<48x128xf32>
    %151 = arith.subf %150, %148 : vector<48x128xf32>
    %152 = arith.mulf %151, %133 : vector<48x128xf32>
    %153 = arith.addf %149, %152 : vector<48x128xf32>
    %154 = tpu.iota {dimensions = array<i32: 0>} : vector<4x48xi32>
    %155 = tpu.iota {dimensions = array<i32: 1>} : vector<4x48xi32>
    %c2_i32 = arith.constant 2 : i32
    %156 = vector.broadcast %c2_i32 : i32 to vector<4x48xi32>
    %157 = arith.cmpi slt, %154, %156 : vector<4x48xi32>
    %c8_i32 = arith.constant 8 : i32
    %158 = vector.broadcast %c8_i32 : i32 to vector<4x48xi32>
    %159 = arith.muli %154, %158 : vector<4x48xi32>
    %160 = arith.cmpi sge, %155, %159 : vector<4x48xi32>
    %161 = arith.andi %157, %160 : vector<4x48xi1>
    %c1_i32 = arith.constant 1 : i32
    %162 = vector.broadcast %c1_i32 : i32 to vector<4x48xi32>
    %163 = arith.addi %154, %162 : vector<4x48xi32>
    %c8_i32_23 = arith.constant 8 : i32
    %164 = vector.broadcast %c8_i32_23 : i32 to vector<4x48xi32>
    %165 = arith.muli %163, %164 : vector<4x48xi32>
    %166 = arith.cmpi slt, %155, %165 : vector<4x48xi32>
    %167 = arith.andi %161, %166 : vector<4x48xi1>
    %c2_i32_24 = arith.constant 2 : i32
    %168 = vector.broadcast %c2_i32_24 : i32 to vector<4x48xi32>
    %169 = arith.cmpi sge, %154, %168 : vector<4x48xi32>
    %c2_i32_25 = arith.constant 2 : i32
    %170 = vector.broadcast %c2_i32_25 : i32 to vector<4x48xi32>
    %171 = arith.subi %154, %170 : vector<4x48xi32>
    %c16_i32 = arith.constant 16 : i32
    %172 = vector.broadcast %c16_i32 : i32 to vector<4x48xi32>
    %173 = arith.muli %171, %172 : vector<4x48xi32>
    %c16_i32_26 = arith.constant 16 : i32
    %174 = vector.broadcast %c16_i32_26 : i32 to vector<4x48xi32>
    %175 = arith.addi %174, %173 : vector<4x48xi32>
    %176 = arith.cmpi sge, %155, %175 : vector<4x48xi32>
    %177 = arith.andi %169, %176 : vector<4x48xi1>
    %c2_i32_27 = arith.constant 2 : i32
    %178 = vector.broadcast %c2_i32_27 : i32 to vector<4x48xi32>
    %179 = arith.subi %154, %178 : vector<4x48xi32>
    %c1_i32_28 = arith.constant 1 : i32
    %180 = vector.broadcast %c1_i32_28 : i32 to vector<4x48xi32>
    %181 = arith.addi %179, %180 : vector<4x48xi32>
    %c16_i32_29 = arith.constant 16 : i32
    %182 = vector.broadcast %c16_i32_29 : i32 to vector<4x48xi32>
    %183 = arith.muli %181, %182 : vector<4x48xi32>
    %c16_i32_30 = arith.constant 16 : i32
    %184 = vector.broadcast %c16_i32_30 : i32 to vector<4x48xi32>
    %185 = arith.addi %184, %183 : vector<4x48xi32>
    %186 = arith.cmpi slt, %155, %185 : vector<4x48xi32>
    %187 = arith.andi %177, %186 : vector<4x48xi1>
    %188 = arith.extui %167 : vector<4x48xi1> to vector<4x48xi32>
    %189 = arith.sitofp %188 : vector<4x48xi32> to vector<4x48xf32>
    %cst_31 = arith.constant 8.000000e+00 : f32
    %190 = vector.broadcast %cst_31 : f32 to vector<4x48xf32>
    %191 = arith.divf %189, %190 : vector<4x48xf32>
    %192 = arith.extui %187 : vector<4x48xi1> to vector<4x48xi32>
    %193 = arith.sitofp %192 : vector<4x48xi32> to vector<4x48xf32>
    %cst_32 = arith.constant 1.600000e+01 : f32
    %194 = vector.broadcast %cst_32 : f32 to vector<4x48xf32>
    %195 = arith.divf %193, %194 : vector<4x48xf32>
    %196 = arith.addf %191, %195 : vector<4x48xf32>
    %197 = arith.truncf %196 : vector<4x48xf32> to vector<4x48xbf16>
    %198 = arith.truncf %153 : vector<48x128xf32> to vector<48x128xbf16>
    %cst_33 = arith.constant dense<0.000000e+00> : vector<4x128xf32>
    %199 = tpu.matmul %197, %198, %cst_33 {dimension_numbers = #tpu.dot_dimension_numbers<[1], [0], [0], [1], [0, 0, 1, 1], [], []>} : vector<4x48xbf16>, vector<48x128xbf16>, vector<4x128xf32> -> vector<4x128xf32>
    %200 = vector.extract_strided_slice %199 {offsets = [0, 0], sizes = [2, 128], strides = [1, 1]} : vector<4x128xf32> to vector<2x128xf32>
    %201 = vector.extract_strided_slice %199 {offsets = [2, 0], sizes = [2, 128], strides = [1, 1]} : vector<4x128xf32> to vector<2x128xf32>
    %202 = tpu.concatenate %200, %201 in 1 : vector<2x128xf32>, vector<2x128xf32> -> vector<2x256xf32>
    %203 = arith.truncf %202 : vector<2x256xf32> to vector<2x256xbf16>
    %c0_34 = arith.constant 0 : index
    %c0_35 = arith.constant 0 : index
    %204 = vector.load %arg4[%c0_34, %c0_35] : memref<256x896xbf16, #tpu.memory_space<vmem>>, vector<256x896xbf16>
    %cst_36 = arith.constant dense<0.000000e+00> : vector<2x896xf32>
    %205 = tpu.matmul %203, %204, %cst_36 {dimension_numbers = #tpu.dot_dimension_numbers<[1], [0], [0], [1], [0, 0, 1, 1], [], []>} : vector<2x256xbf16>, vector<256x896xbf16>, vector<2x896xf32> -> vector<2x896xf32>
    %206 = vector.extract_strided_slice %3 {offsets = [3, 0], sizes = [1, 896], strides = [1, 1]} : vector<8x896xf32> to vector<1x896xf32>
    %207 = vector.broadcast %206 : vector<1x896xf32> to vector<2x896xf32>
    %208 = arith.addf %205, %207 : vector<2x896xf32>
    %c0_37 = arith.constant 0 : index
    %c0_38 = arith.constant 0 : index
    %209 = vector.load %arg6[%c0_37, %c0_38] : memref<2x896xf32, #tpu.memory_space<vmem>>, vector<2x896xf32>
    tpu.vector_store %arg6[%c0_37, %c0_38], %208 {strides = array<i32>} : memref<2x896xf32, #tpu.memory_space<vmem>>, vector<2x896xf32>,
    return
  }
  func.func @transform_0(%arg0: i32) -> (i32, i32) {
    %c0_i32 = arith.constant 0 : i32
    %c0_i32_0 = arith.constant 0 : i32
    %c0_i32_1 = arith.constant 0 : i32
    return %c0_i32, %c0_i32_0 : i32, i32
  }
  func.func @transform_1(%arg0: i32) -> (i32, i32) {
    %c0_i32 = arith.constant 0 : i32
    %c0_i32_0 = arith.constant 0 : i32
    %c0_i32_1 = arith.constant 0 : i32
    return %c0_i32, %c0_i32_0 : i32, i32
  }
  func.func @transform_2(%arg0: i32) -> (i32, i32) {
    %c0_i32 = arith.constant 0 : i32
    %c0_i32_0 = arith.constant 0 : i32
    %c0_i32_1 = arith.constant 0 : i32
    return %c0_i32, %c0_i32_0 : i32, i32
  }
  func.func @transform_3(%arg0: i32) -> (i32, i32) {
    %c0_i32 = arith.constant 0 : i32
    %c0_i32_0 = arith.constant 0 : i32
    %c0_i32_1 = arith.constant 0 : i32
    return %c0_i32, %c0_i32_0 : i32, i32
  }
  func.func @transform_4(%arg0: i32) -> (i32, i32) {
    %c0_i32 = arith.constant 0 : i32
    %c0_i32_0 = arith.constant 0 : i32
    %c0_i32_1 = arith.constant 0 : i32
    return %c0_i32, %c0_i32_0 : i32, i32
  }
  func.func @transform_5(%arg0: i32) -> (i32, i32) {
    %c0_i32 = arith.constant 0 : i32
    %c0_i32_0 = arith.constant 0 : i32
    %c0_i32_1 = arith.constant 0 : i32
    return %c0_i32, %c0_i32_0 : i32, i32
  }
}

</mosaic_0001>

<bundles_post_ra>
// kernel: forward.1
= control target key start
LH: loop header
LB: loop body
LE: loop exit
PB: predicated region body
PF: predicated region fallthrough
CT: control target
= control target key end

     0   :  { %10 = vsyncpa [#allocation3], 0  ;;  %s4714_s18 = smov [#allocation2]   ;;  %s5652_s0 = inlined_call_operand.vmem [shape: s32[48,11], index: 0, kind: input, shape index: {}]   ;;  %s5653_s1 = inlined_call_operand.vmem [shape: bf16[256,64], index: 1, kind: input, shape index: {}]   ;;  %s5654_s2 = inlined_call_operand.vmem [shape: bf16[256,256], index: 2, kind: input, shape index: {}]   ;;  %s5655_s3 = inlined_call_operand.hbm [shape: bf16[256,896], index: 3, kind: input, shape index: {}]   ;;  %s5656_s4 = inlined_call_operand.vmem [shape: f32[8,896], index: 4, kind: input, shape index: {}]   ;;  %s5657_s5 = inlined_call_operand.vmem [shape: f32[2,896], index: 5, kind: output, shape index: {}]  }
   0x1   :  { %s22_s19 = sshll.u32 %s4714_s18, 4  ;;  %s4690_s22 = scalar_lea.hbm %s5655_s3, 14336  ;;  %s23_s19 = int_to_ptr.vmem [resolvable:$true] %s22_s19 }
   0x2   :  { %p4691_p0 = scmp.ne.s32.totalorder %s5655_s3, %s4690_s22  ;;  %p4694_p1 = scmp.lt.u32.totalorder %s4690_s22, %s5655_s3 }
   0x4   :  { %p4696_p2 = pnand %p4694_p1, %p4691_p0 }
   0x6   :  { %4699 = shalt.err (!%p4696_p2)
}
   0x7   :  { %s4700_s27 = scalar_lea.vmem %s23_s19, 14336  ;;  %p4705_p4 = scmp.lt.s32.totalorder %s23_s19, %s23_s19 }
   0x8   :  { %p4701_p3 = scmp.ne.s32.totalorder %s23_s19, %s4700_s27  ;;  %p4706_p5 = scmp.lt.s32.totalorder %s4700_s27, %s4700_s27 }
   0xa   :  { %p4707_p6 = por %p4706_p5, %p4705_p4 }
   0xc   :  { %p4708_p7 = pnand %p4707_p6, %p4701_p3 }
   0xe   :  { %4711 = shalt.err (!%p4708_p7)
}
   0xf   :  { %s4715_s28 = smov 448   ;;  %s4716_s29 = smov 28  }
  0x10   :  { %28 = dma.hbm_to_vmem [thread:$0]  %s5655_s3, 14336, %s23_s19, [#allocation3], %s4715_s28, %s4715_s28, %s4716_s29  }
  0x11   :  { %4712 = dma.done.wait [#allocation3], 14336  }
  0x12   :  { %4713 = vsyncadd [#allocation3], 4294952960  ;;  %v4717_v0 = vmov 1   ;;  %v4718_v1 = vmov 0.0   ;;  %v4778_v2 = vld [vmem:[%s5652_s0 + $0x10] sm:$0xff]  ;;  %v4783_v3 = vld [vmem:[%s5652_s0] sm:$0xff]  ;;  %v112_v20 = vlaneseq }
  0x13   :  { %4386 = vset.pattern.permute.xlu1 %v4717_v0  ;;  %4385 = vset.pattern.permute.xlu0 %v4717_v0  ;;  %v4790_v4 = vld [vmem:[%s5652_s0 + $0x18] sm:$0xff]  ;;  %v4795_v5 = vld [vmem:[%s5652_s0 + $0x8] sm:$0xff]  ;;  %v4811_v9 = vld [vmem:[%s5652_s0 + $0x20] sm:$0xff]  ;;  %vm710_vm0 = vcmask 1043456   ;;  %v4719_v12 = vmov 2   ;;  %v4720_v14 = vmov 3  }
  0x14   :  { %3942 = vmatprep.subr.bf16.mxu0 %v4718_v1  ;;  %252 = vperm.xlu1 %4386, %v4778_v2   ;;  %v4408_v6 = vld [vmem:[%s5653_s1 + $0x1c] sm:$0xff]   ;;  %v4409_v7 = vld [vmem:[%s5653_s1 + $0x24] sm:$0xff]   ;;  %v4410_v10 = vld [vmem:[%s5653_s1 + $0x2c] ss:$0 sps:$4 sm:$0xff]   ;;  %v4721_v15 = vmov 4   ;;  %v4722_v16 = vmov 5  }
  0x15   :  { %246 = vperm.xlu0 %4385, %v4783_v3   ;;  %v4806_v8 = vld [vmem:[%s5652_s0 + $0x28] sm:$0xff]  ;;  %3962 = vmatprep.subr.bf16.mxu1 %v4408_v6  ;;  %v712_v11 = vsel %vm710_vm0, %v4410_v10, 0  ;;  %v4831_v13 = vld [vmem:[%s5653_s1 + $0x30] sm:$0xff]   ;;  %v4723_v17 = vmov 6   ;;  %v4724_v18 = vmov 7   ;;  %v4725_v19 = vmov 8  }
  0x16   :  { %3963 = vmatpush3.bf16.msra.mxu1 %v4408_v6  ;;  %v4871_v21 = vand.u32 127, %v112_v20  ;;  %vm655_vm5 = vcmask 326656   ;;  %v4412_v34 = vld [vmem:[%s5653_s1 + $0x38] sm:$0xff]   ;;  %v4413_v38 = vld [vmem:[%s5653_s1 + $0x40] ss:$0 sps:$4 sm:$0xff]   ;;  %v4906_v45 = vld [vmem:[%s5653_s1 + $0x44] sm:$0xff]  }
  0x17   :  { %3964 = vmatprep.subr.bf16.mxu1 %v4409_v7  ;;  %v952_v44 = vsel %vm710_vm0, %v4413_v38, 0  ;;  %v4726_v46 = vmov 9   ;;  %s4730_s20 = smov 50  }
  0x18   :  { %255 = vperm.xlu1 %4386, %v4790_v4  }
  0x19   :  { %249 = vperm.xlu0 %4385, %v4795_v5  }
  0x1a   :  { %3965 = vmatpush3.bf16.msra.mxu1 %v4409_v7 }
  0x1b   :  { %4362 = vmatprep.subr.msk.bf16.mxu1 %vm710_vm0, %v4410_v10 }
  0x1c   :  { %261 = vperm.xlu1 %4386, %v4806_v8  }
  0x1d   :  { %258 = vperm.xlu0 %4385, %v4811_v9  }
  0x1e   :  { %3967 = vmatpush3.bf16.msra.mxu1 %v712_v11 }
  0x1f   :  { %4004 = vmatprep.subr.bf16.mxu1 %v4831_v13 }
  0x20   :  { %4388 = vset.pattern.permute.xlu1 %v4719_v12 }
  0x21   :  { %4387 = vset.pattern.permute.xlu0 %v4719_v12  ;;  %288 = vperm.xlu1 %4388, %v4795_v5  }
  0x22   :  { %285 = vperm.xlu0 %4387, %v4783_v3  }
  0x25   :  { %291 = vperm.xlu1 %4388, %v4778_v2  }
  0x26   :  { %294 = vperm.xlu0 %4387, %v4790_v4  }
  0x29   :  { %297 = vperm.xlu1 %4388, %v4811_v9  }
  0x2a   :  { %300 = vperm.xlu0 %4387, %v4806_v8  }
  0x2d   :  { %4389 = vset.pattern.permute.xlu1 %v4720_v14 }
  0x2e   :  { %4390 = vset.pattern.permute.xlu0 %v4720_v14  ;;  %324 = vperm.xlu1 %4389, %v4783_v3  }
  0x2f   :  { %327 = vperm.xlu0 %4390, %v4795_v5  }
  0x32   :  { %330 = vperm.xlu1 %4389, %v4778_v2  }
  0x33   :  { %336 = vperm.xlu0 %4390, %v4811_v9  }
  0x36   :  { %333 = vperm.xlu1 %4389, %v4790_v4  }
  0x37   :  { %4391 = vset.pattern.permute.xlu0 %v4721_v15 }
  0x38   :  { %363 = vperm.xlu0 %4391, %v4783_v3  }
  0x3a   :  { %339 = vperm.xlu1 %4389, %v4806_v8  }
  0x3c   :  { %372 = vperm.xlu0 %4391, %v4790_v4  }
  0x3e   :  { %4392 = vset.pattern.permute.xlu1 %v4721_v15 }
  0x3f   :  { %366 = vperm.xlu1 %4392, %v4795_v5  }
  0x40   :  { %378 = vperm.xlu0 %4391, %v4806_v8  }
  0x43   :  { %369 = vperm.xlu1 %4392, %v4778_v2  }
  0x44   :  { %4394 = vset.pattern.permute.xlu0 %v4722_v16 }
  0x45   :  { %405 = vperm.xlu0 %4394, %v4795_v5  }
  0x47   :  { %375 = vperm.xlu1 %4392, %v4811_v9  }
  0x49   :  { %414 = vperm.xlu0 %4394, %v4811_v9  }
  0x4b   :  { %4393 = vset.pattern.permute.xlu1 %v4722_v16 }
  0x4c   :  { %402 = vperm.xlu1 %4393, %v4783_v3  }
  0x4d   :  { %4395 = vset.pattern.permute.xlu0 %v4723_v17 }
  0x4e   :  { %441 = vperm.xlu0 %4395, %v4783_v3  }
  0x50   :  { %408 = vperm.xlu1 %4393, %v4778_v2  }
  0x52   :  { %450 = vperm.xlu0 %4395, %v4790_v4  }
  0x54   :  { %411 = vperm.xlu1 %4393, %v4790_v4  }
  0x56   :  { %456 = vperm.xlu0 %4395, %v4806_v8  }
  0x58   :  { %417 = vperm.xlu1 %4393, %v4806_v8  }
  0x5a   :  { %4398 = vset.pattern.permute.xlu0 %v4724_v18 }
  0x5b   :  { %483 = vperm.xlu0 %4398, %v4795_v5  }
  0x5c   :  { %4396 = vset.pattern.permute.xlu1 %v4723_v17 }
  0x5d   :  { %444 = vperm.xlu1 %4396, %v4795_v5  }
  0x5f   :  { %492 = vperm.xlu0 %4398, %v4811_v9  }
  0x61   :  { %447 = vperm.xlu1 %4396, %v4778_v2  }
  0x63   :  { %4399 = vset.pattern.permute.xlu0 %v4725_v19 }
  0x64   :  { %519 = vperm.xlu0 %4399, %v4783_v3  }
  0x65   :  { %453 = vperm.xlu1 %4396, %v4811_v9  }
  0x68   :  { %528 = vperm.xlu0 %4399, %v4790_v4  }
  0x69   :  { %4397 = vset.pattern.permute.xlu1 %v4724_v18 }
  0x6a   :  { %480 = vperm.xlu1 %4397, %v4783_v3  }
  0x6c   :  { %534 = vperm.xlu0 %4399, %v4806_v8  }
  0x6e   :  { %486 = vperm.xlu1 %4397, %v4778_v2  }
  0x70   :  { %4402 = vset.pattern.permute.xlu0 %v4726_v46 }
  0x71   :  { %561 = vperm.xlu0 %4402, %v4795_v5  }
  0x72   :  { %489 = vperm.xlu1 %4397, %v4790_v4  }
  0x75   :  { %570 = vperm.xlu0 %4402, %v4811_v9  }
  0x76   :  { %495 = vperm.xlu1 %4397, %v4806_v8  }
  0x7a   :  { %4400 = vset.pattern.permute.xlu1 %v4725_v19 }
  0x7b   :  { %522 = vperm.xlu1 %4400, %v4795_v5  }
  0x7f   :  { %525 = vperm.xlu1 %4400, %v4778_v2  }
  0x83   :  { %531 = vperm.xlu1 %4400, %v4811_v9  }
  0x87   :  { %4401 = vset.pattern.permute.xlu1 %v4726_v46 }
  0x88   :  { %558 = vperm.xlu1 %4401, %v4783_v3  }
  0x8c   :  { %564 = vperm.xlu1 %4401, %v4778_v2  }
  0x90   :  { %567 = vperm.xlu1 %4401, %v4790_v4  }
  0x93   :  { %v253_v22 = vpop.permute.xlu1 %252 }
  0x94   :  { %v247_v23 = vpop.permute.xlu0 %246  ;;  %vm265_vm2 = vcmp.eq.s32.totalorder %v4871_v21, %v253_v22  ;;  %573 = vperm.xlu1 %4401, %v4806_v8  }
  0x95   :  { %vm263_vm1 = vcmp.eq.s32.totalorder %v4871_v21, %v247_v23  ;;  %v3472_v27 = vsel %vm265_vm2, 1.0, %v4718_v1 }
  0x96   :  { %v3470_v24 = vsel %vm263_vm1, 1.0, %v4718_v1 }
  0x97   :  { %v256_v25 = vpop.permute.xlu1 %255 }
  0x98   :  { %v250_v26 = vpop.permute.xlu0 %249  ;;  %vm266_vm3 = vcmp.eq.s32.totalorder %v4871_v21, %v256_v25 }
  0x99   :  { %vm264_vm4 = vcmp.eq.s32.totalorder %v4871_v21, %v250_v26  ;;  %v3473_v28 = vsel %vm266_vm3, 1.0, %v4718_v1 }
  0x9a   :  { %v3471_v29 = vsel %vm264_vm4, 1.0, %v4718_v1  ;;  %v282_v30 = vpack.c.bf16 %v3473_v28, %v3472_v27 }
  0x9b   :  { %v281_v31 = vpack.c.bf16 %v3471_v29, %v3470_v24  ;;  %v262_v32 = vpop.permute.xlu1 %261 }
  0x9c   :  { %v259_v33 = vpop.permute.xlu0 %258  ;;  %vm268_vm6 = vcmp.eq.s32.totalorder %v4871_v21, %v262_v32 }
  0x9d   :  { %vm267_vm7 = vcmp.eq.s32.totalorder %v4871_v21, %v259_v33  ;;  %3968 = vmatprep.mubr.msk.bf16.mxu1 %vm655_vm5, %v281_v31  ;;  %v3475_v35 = vsel %vm268_vm6, 1.0, %v4718_v1 }
  0x9e   :  { %v3474_v36 = vsel %vm267_vm7, 1.0, %v4718_v1  ;;  %3969 = vmatmul.mubr.msk.bf16.vlgmr.msra.gmra.mrb[0].mxu1 %vm655_vm5, %v282_v30 }
  0x9f   :  { %v283_v37 = vpack.c.bf16 %v3475_v35, %v3474_v36  ;;  %4005 = vmatpush3.bf16.msra.mxu1 %v4831_v13 }
  0xa0   :  { %4006 = vmatprep.subr.bf16.mxu1 %v4412_v34  ;;  %v289_v39 = vpop.permute.xlu1 %288 }
  0xa1   :  { %3972 = vmatprep.mubr.msk.bf16.mxu1 %vm655_vm5, %v283_v37  ;;  %v286_v40 = vpop.permute.xlu0 %285  ;;  %vm303_vm8 = vcmp.eq.s32.totalorder %v4871_v21, %v289_v39 }
  0xa2   :  { %vm302_vm9 = vcmp.eq.s32.totalorder %v4871_v21, %v286_v40  ;;  %v3477_v41 = vsel %vm303_vm8, 1.0, %v4718_v1 }
  0xa3   :  { %v3476_v42 = vsel %vm302_vm9, 1.0, %v4718_v1  ;;  %4007 = vmatpush3.bf16.msra.mxu1 %v4412_v34 }
  0xa4   :  { %v4899_v43 = vpack.c.bf16 %v3477_v41, %v3476_v42  ;;  %4363 = vmatprep.subr.msk.bf16.mxu1 %vm710_vm0, %v4413_v38  ;;  %v292_v47 = vpop.permute.xlu1 %291 }
  0xa5   :  { %v295_v48 = vpop.permute.xlu0 %294  ;;  %vm304_vm10 = vcmp.eq.s32.totalorder %v4871_v21, %v292_v47 }
  0xa6   :  { %vm305_vm11 = vcmp.eq.s32.totalorder %v4871_v21, %v295_v48  ;;  %3973 = vmatmul.mubr.msk.bf16.gmra.mrb[4].mxu1 %vm655_vm5, %v4899_v43  ;;  %v3478_v49 = vsel %vm304_vm10, 1.0, %v4718_v1 }
  0xa7   :  { %v3479_v50 = vsel %vm305_vm11, 1.0, %v4718_v1  ;;  %4009 = vmatpush3.bf16.msra.mxu1 %v952_v44 }
  0xa8   :  { %v4916_v51 = vpack.c.bf16 %v3479_v50, %v3478_v49  ;;  %4046 = vmatprep.subr.bf16.mxu1 %v4906_v45  ;;  %v298_v52 = vpop.permute.xlu1 %297 }
  0xa9   :  { %v301_v53 = vpop.permute.xlu0 %300  ;;  %vm306_vm12 = vcmp.eq.s32.totalorder %v4871_v21, %v298_v52 }
  0xaa   :  { %vm307_vm13 = vcmp.eq.s32.totalorder %v4871_v21, %v301_v53  ;;  %3976 = vmatprep.mubr.msk.bf16.mxu1 %vm655_vm5, %v4916_v51  ;;  %v3480_v54 = vsel %vm306_vm12, 1.0, %v4718_v1 }
  0xab   :  { %v3481_v55 = vsel %vm307_vm13, 1.0, %v4718_v1 }
  0xac   :  { %v4927_v56 = vpack.c.bf16 %v3481_v55, %v3480_v54 }
  0xad   :  { %v325_v57 = vpop.permute.xlu1 %324 }
  0xae   :  { %3977 = vmatmul.mubr.msk.bf16.gmra.mrb[8].mxu1 %vm655_vm5, %v4927_v56  ;;  %v328_v58 = vpop.permute.xlu0 %327  ;;  %vm341_vm14 = vcmp.eq.s32.totalorder %v4871_v21, %v325_v57 }
  0xaf   :  { %vm342_vm15 = vcmp.eq.s32.totalorder %v4871_v21, %v328_v58  ;;  %v3482_v59 = vsel %vm341_vm14, 1.0, %v4718_v1 }
  0xb0   :  { %v3483_v60 = vsel %vm342_vm15, 1.0, %v4718_v1 }
  0xb1   :  { %v4936_v61 = vpack.c.bf16 %v3483_v60, %v3482_v59  ;;  %v331_v62 = vpop.permute.xlu1 %330 }
  0xb2   :  { %v337_v63 = vpop.permute.xlu0 %336  ;;  %vm343_vm1 = vcmp.eq.s32.totalorder %v4871_v21, %v331_v62 }
  0xb3   :  { %3980 = vmatprep.mubr.msk.bf16.mxu1 %vm655_vm5, %v4936_v61  ;;  %vm345_vm3 = vcmp.eq.s32.totalorder %v4871_v21, %v337_v63  ;;  %v3484_v7 = vsel %vm343_vm1, 1.0, %v4718_v1 }
  0xb4   :  { %v3486_v12 = vsel %vm345_vm3, 1.0, %v4718_v1 }
  0xb5   :  { %v334_v0 = vpop.permute.xlu1 %333 }
  0xb6   :  { %vm344_vm2 = vcmp.eq.s32.totalorder %v4871_v21, %v334_v0 }
  0xb7   :  { %v364_v6 = vpop.permute.xlu0 %363  ;;  %v3485_v10 = vsel %vm344_vm2, 1.0, %v4718_v1 }
  0xb8   :  { %v4946_v11 = vpack.c.bf16 %v3485_v10, %v3484_v7  ;;  %vm380_vm6 = vcmp.eq.s32.totalorder %v4871_v21, %v364_v6  ;;  %v4415_v10 = vld [vmem:[%s5653_s1 + $0x4c] sm:$0xff]  }
  0xb9   :  { %v340_v13 = vpop.permute.xlu1 %339  ;;  %v3488_v17 = vsel %vm380_vm6, 1.0, %v4718_v1 }
  0xba   :  { %vm346_vm4 = vcmp.eq.s32.totalorder %v4871_v21, %v340_v13  ;;  %3981 = vmatmul.mubr.msk.bf16.gmra.mrb[12].mxu1 %vm655_vm5, %v4946_v11  ;;  %v4727_v13 = vmov 10  }
  0xbb   :  { %v3487_v14 = vsel %vm346_vm4, 1.0, %v4718_v1  ;;  %v373_v15 = vpop.permute.xlu0 %372  ;;  %4404 = vset.pattern.permute.xlu1 %v4727_v13  ;;  %4403 = vset.pattern.permute.xlu0 %v4727_v13 }
  0xbc   :  { %v4954_v16 = vpack.c.bf16 %v3487_v14, %v3486_v12  ;;  %vm383_vm8 = vcmp.eq.s32.totalorder %v4871_v21, %v373_v15  ;;  %v4416_v12 = vld [vmem:[%s5653_s1 + $0x54] ss:$0 sps:$4 sm:$0xff]   ;;  %600 = vperm.xlu1 %4404, %v4795_v5   ;;  %597 = vperm.xlu0 %4403, %v4783_v3  }
  0xbd   :  { %v3491_v24 = vsel %vm383_vm8, 1.0, %v4718_v1 }
  0xbe   :  { %v367_v18 = vpop.permute.xlu1 %366  ;;  %3984 = vmatprep.mubr.msk.bf16.mxu1 %vm655_vm5, %v4954_v16 }
  0xbf   :  { %vm381_vm7 = vcmp.eq.s32.totalorder %v4871_v21, %v367_v18  ;;  %v379_v23 = vpop.permute.xlu0 %378 }
  0xc0   :  { %v3489_v19 = vsel %vm381_vm7, 1.0, %v4718_v1  ;;  %vm385_vm10 = vcmp.eq.s32.totalorder %v4871_v21, %v379_v23  ;;  %603 = vperm.xlu1 %4404, %v4778_v2   ;;  %606 = vperm.xlu0 %4403, %v4790_v4  }
  0xc1   :  { %v4962_v22 = vpack.c.bf16 %v3489_v19, %v3488_v17  ;;  %v3493_v30 = vsel %vm385_vm10, 1.0, %v4718_v1 }
  0xc2   :  { %v370_v25 = vpop.permute.xlu1 %369 }
  0xc3   :  { %vm382_vm9 = vcmp.eq.s32.totalorder %v4871_v21, %v370_v25  ;;  %3985 = vmatmul.mubr.msk.bf16.gmra.mrb[16].mxu1 %vm655_vm5, %v4962_v22  ;;  %v4418_v25 = vld [vmem:[%s5653_s1 + $0x60] sm:$0xff]  }
  0xc4   :  { %v3490_v26 = vsel %vm382_vm9, 1.0, %v4718_v1  ;;  %v406_v28 = vpop.permute.xlu0 %405  ;;  %609 = vperm.xlu1 %4404, %v4811_v9   ;;  %612 = vperm.xlu0 %4403, %v4806_v8  }
  0xc5   :  { %v4969_v27 = vpack.c.bf16 %v3491_v24, %v3490_v26  ;;  %vm420_vm12 = vcmp.eq.s32.totalorder %v4871_v21, %v406_v28  ;;  %v4419_v26 = vld [vmem:[%s5653_s1 + $0x68] ss:$0 sps:$4 sm:$0xff]   ;;  %v4420_v28 = vld [vmem:[%s5653_s1 + $0x6c] sm:$0xff]  }
  0xc6   :  { %v376_v29 = vpop.permute.xlu1 %375  ;;  %v3495_v34 = vsel %vm420_vm12, 1.0, %v4718_v1 }
  0xc7   :  { %vm384_vm11 = vcmp.eq.s32.totalorder %v4871_v21, %v376_v29  ;;  %3988 = vmatprep.mubr.msk.bf16.mxu1 %vm655_vm5, %v4969_v27  ;;  %v4728_v29 = vmov 0  }
  0xc8   :  { %v3492_v31 = vsel %vm384_vm11, 1.0, %v4718_v1  ;;  %v415_v37 = vpop.permute.xlu0 %414  ;;  %4405 = vset.pattern.permute.xlu1 %v4728_v29  ;;  %4406 = vset.pattern.permute.xlu0 %v4728_v29 }
  0xc9   :  { %v4978_v32 = vpack.c.bf16 %v3493_v30, %v3492_v31  ;;  %vm423_vm1 = vcmp.eq.s32.totalorder %v4871_v21, %v415_v37  ;;  %v4683_v30 = vld [vmem:[%s5652_s0] sm:$0xff]  ;;  %v4684_v31 = vld [vmem:[%s5652_s0 + $0x8] sm:$0xff] }
  0xca   :  { %v3498_v47 = vsel %vm423_vm1, 1.0, %v4718_v1  ;;  %115 = vperm.xlu1 %4405, %v4683_v30   ;;  %118 = vperm.xlu0 %4406, %v4684_v31   ;;  %v4686_v37 = vld [vmem:[%s5652_s0 + $0x20] sm:$0xff] }
  0xcb   :  { %v403_v33 = vpop.permute.xlu1 %402  ;;  %3989 = vmatmul.mubr.msk.bf16.gmra.mrb[20].mxu1 %vm655_vm5, %v4978_v32 }
  0xcc   :  { %vm419_vm13 = vcmp.eq.s32.totalorder %v4871_v21, %v403_v33 }
  0xcd   :  { %v3494_v35 = vsel %vm419_vm13, 1.0, %v4718_v1  ;;  %v442_v40 = vpop.permute.xlu0 %441 }
  0xce   :  { %v4985_v36 = vpack.c.bf16 %v3495_v34, %v3494_v35  ;;  %vm458_vm3 = vcmp.eq.s32.totalorder %v4871_v21, %v442_v40  ;;  %v4685_v35 = vld [vmem:[%s5652_s0 + $0x10] sm:$0xff]  ;;  %127 = vperm.xlu0 %4406, %v4686_v37  }
  0xcf   :  { %v409_v38 = vpop.permute.xlu1 %408  ;;  %v3500_v52 = vsel %vm458_vm3, 1.0, %v4718_v1  ;;  %121 = vperm.xlu1 %4405, %v4685_v35  }
  0xd0   :  { %3992 = vmatprep.mubr.msk.bf16.mxu1 %vm655_vm5, %v4985_v36  ;;  %vm421_vm14 = vcmp.eq.s32.totalorder %v4871_v21, %v409_v38 }
  0xd1   :  { %v3496_v41 = vsel %vm421_vm14, 1.0, %v4718_v1  ;;  %v451_v50 = vpop.permute.xlu0 %450 }
  0xd2   :  { %vm461_vm6 = vcmp.eq.s32.totalorder %v4871_v21, %v451_v50  ;;  %4407 = vset.pattern.permute.xlu0 %v4727_v13 }
  0xd3   :  { %v412_v39 = vpop.permute.xlu1 %411  ;;  %v3503_v59 = vsel %vm461_vm6, 1.0, %v4718_v1 }
  0xd4   :  { %vm422_vm15 = vcmp.eq.s32.totalorder %v4871_v21, %v412_v39 }
  0xd5   :  { %v3497_v42 = vsel %vm422_vm15, 1.0, %v4718_v1  ;;  %v457_v57 = vpop.permute.xlu0 %456 }
  0xd6   :  { %v4994_v44 = vpack.c.bf16 %v3497_v42, %v3496_v41  ;;  %vm463_vm8 = vcmp.eq.s32.totalorder %v4871_v21, %v457_v57  ;;  %v4687_v42 = vld [vmem:[%s5652_s0 + $0x18] sm:$0xff] }
  0xd7   :  { %v418_v46 = vpop.permute.xlu1 %417  ;;  %v3505_v0 = vsel %vm463_vm8, 1.0, %v4718_v1  ;;  %124 = vperm.xlu1 %4405, %v4687_v42   ;;  %vm4729_vm8 = vmmov 0  }
  0xd8   :  { %vm424_vm2 = vcmp.eq.s32.totalorder %v4871_v21, %v418_v46  ;;  %3993 = vmatmul.mubr.msk.bf16.gmra.mrb[24].mxu1 %vm655_vm5, %v4994_v44  ;;  %3950 = vmatprep.mubr.msk.bf16.mxu0 %vm4729_vm8, %v4718_v1 }
  0xd9   :  { %v3499_v48 = vsel %vm424_vm2, 1.0, %v4718_v1 }
  0xda   :  { %v5002_v49 = vpack.c.bf16 %v3499_v48, %v3498_v47  ;;  %v484_v5 = vpop.permute.xlu0 %483 }
  0xdb   :  { %vm498_vm11 = vcmp.eq.s32.totalorder %v4871_v21, %v484_v5 }
  0xdc   :  { %v445_v53 = vpop.permute.xlu1 %444  ;;  %3996 = vmatprep.mubr.msk.bf16.mxu1 %vm655_vm5, %v5002_v49  ;;  %v3507_v9 = vsel %vm498_vm11, 1.0, %v4718_v1 }
  0xdd   :  { %vm459_vm4 = vcmp.eq.s32.totalorder %v4871_v21, %v445_v53 }
  0xde   :  { %v3501_v54 = vsel %vm459_vm4, 1.0, %v4718_v1  ;;  %v493_v15 = vpop.permute.xlu0 %492 }
  0xdf   :  { %v5010_v55 = vpack.c.bf16 %v3501_v54, %v3500_v52  ;;  %vm501_vm15 = vcmp.eq.s32.totalorder %v4871_v21, %v493_v15  ;;  %v4688_v52 = vld [vmem:[%s5652_s0 + $0x28] sm:$0xff] }
  0xe0   :  { %v448_v58 = vpop.permute.xlu1 %447  ;;  %v3510_v23 = vsel %vm501_vm15, 1.0, %v4718_v1  ;;  %130 = vperm.xlu1 %4405, %v4688_v52   ;;  %v4430_v52 = vld [vmem:[%s5654_s2 + $0x10] ss:$8 sps:$4 sm:$0xff]  }
  0xe1   :  { %vm460_vm7 = vcmp.eq.s32.totalorder %v4871_v21, %v448_v58  ;;  %3997 = vmatmul.mubr.msk.bf16.gmra.mrb[28].mxu1 %vm655_vm5, %v5010_v55  ;;  %v4421_v58 = vld [vmem:[%s5653_s1 + $0x74] sm:$0xff]  }
  0xe2   :  { %v3502_v60 = vsel %vm460_vm7, 1.0, %v4718_v1 }
  0xe3   :  { %v5018_v62 = vpack.c.bf16 %v3503_v59, %v3502_v60  ;;  %v4422_v59 = vld [vmem:[%s5653_s1 + $0x7c] ss:$0 sps:$4 sm:$0xff]   ;;  %v4425_v60 = vld [vmem:[%s5653_s1 + $0x10] sm:$0xff]  }
  0xe4   :  { %v454_v63 = vpop.permute.xlu1 %453 }
  0xe5   :  { %vm462_vm9 = vcmp.eq.s32.totalorder %v4871_v21, %v454_v63  ;;  %4000 = vmatprep.mubr.msk.bf16.mxu1 %vm655_vm5, %v5018_v62  ;;  %v4426_v63 = vld [vmem:[%s5653_s1 + $0x18] ss:$0 sps:$4 sm:$0xff]  }
  0xe6   :  { %v3504_v6 = vsel %vm462_vm9, 1.0, %v4718_v1 }
  0xe7   :  { %v5025_v7 = vpack.c.bf16 %v3505_v0, %v3504_v6 }
  0xe9   :  { %4001 = vmatmul.mubr.msk.bf16.gmra.mrb[32].mxu1 %vm655_vm5, %v5025_v7  ;;  %v481_v2 = vpop.permute.xlu1 %480 }
  0xea   :  { %4010 = vmatprep.mubr.msk.bf16.mxu1 %vm655_vm5, %v4899_v43  ;;  %v1192_v43 = vsel %vm710_vm0, %v4416_v12, 0  ;;  %vm497_vm10 = vcmp.eq.s32.totalorder %v4871_v21, %v481_v2 }
  0xeb   :  { %v3506_v8 = vsel %vm497_vm10, 1.0, %v4718_v1 }
  0xec   :  { %v5087_v17 = vpack.c.bf16 %v3507_v9, %v3506_v8 }
  0xed   :  { %v487_v3 = vpop.permute.xlu1 %486 }
  0xee   :  { %vm499_vm12 = vcmp.eq.s32.totalorder %v4871_v21, %v487_v3 }
  0xf1   :  { %4011 = vmatmul.mubr.msk.bf16.vlgmr.msra.gmra.mrb[0].mxu1 %vm655_vm5, %v4916_v51  ;;  %v490_v4 = vpop.permute.xlu1 %489  ;;  %v3508_v51 = vsel %vm499_vm12, 1.0, %v4718_v1 }
  0xf2   :  { %4014 = vmatprep.mubr.msk.bf16.mxu1 %vm655_vm5, %v4927_v56  ;;  %4047 = vmatpush3.bf16.msra.mxu1 %v4906_v45  ;;  %v4417_v45 = vld [vmem:[%s5653_s1 + $0x58] sm:$0xff]   ;;  %vm500_vm13 = vcmp.eq.s32.totalorder %v4871_v21, %v490_v4 }
  0xf3   :  { %4048 = vmatprep.subr.bf16.mxu1 %v4415_v10  ;;  %v3509_v56 = vsel %vm500_vm13, 1.0, %v4718_v1 }
  0xf4   :  { %v5089_v18 = vpack.c.bf16 %v3509_v56, %v3508_v51 }
  0xf5   :  { %v496_v14 = vpop.permute.xlu1 %495 }
  0xf6   :  { %4049 = vmatpush3.bf16.msra.mxu1 %v4415_v10  ;;  %vm502_vm14 = vcmp.eq.s32.totalorder %v4871_v21, %v496_v14 }
  0xf7   :  { %4364 = vmatprep.subr.msk.bf16.mxu1 %vm710_vm0, %v4416_v12  ;;  %v3511_v19 = vsel %vm502_vm14, 1.0, %v4718_v1 }
  0xf8   :  { %v5099_v24 = vpack.c.bf16 %v3511_v19, %v3510_v23 }
  0xf9   :  { %4015 = vmatmul.mubr.msk.bf16.gmra.mrb[4].mxu1 %vm655_vm5, %v4936_v61 }
  0xfa   :  { %4018 = vmatprep.mubr.msk.bf16.mxu1 %vm655_vm5, %v4946_v11  ;;  %4051 = vmatpush3.bf16.msra.mxu1 %v1192_v43 }
  0xfb   :  { %4088 = vmatprep.subr.bf16.mxu1 %v4417_v45 }
 0x101   :  { %4019 = vmatmul.mubr.msk.bf16.gmra.mrb[8].mxu1 %vm655_vm5, %v4954_v16 }
 0x102   :  { %4022 = vmatprep.mubr.msk.bf16.mxu1 %vm655_vm5, %v4962_v22 }
 0x109   :  { %4023 = vmatmul.mubr.msk.bf16.gmra.mrb[12].mxu1 %vm655_vm5, %v4969_v27 }
 0x10a   :  { %4026 = vmatprep.mubr.msk.bf16.mxu1 %vm655_vm5, %v4978_v32 }
 0x111   :  { %4027 = vmatmul.mubr.msk.bf16.gmra.mrb[16].mxu1 %vm655_vm5, %v4985_v36 }
 0x112   :  { %4030 = vmatprep.mubr.msk.bf16.mxu1 %vm655_vm5, %v4994_v44 }
 0x119   :  { %4031 = vmatmul.mubr.msk.bf16.gmra.mrb[20].mxu1 %vm655_vm5, %v5002_v49 }
 0x11a   :  { %4034 = vmatprep.mubr.msk.bf16.mxu1 %vm655_vm5, %v5010_v55 }
 0x121   :  { %4035 = vmatmul.mubr.msk.bf16.gmra.mrb[24].mxu1 %vm655_vm5, %v5018_v62 }
 0x122   :  { %4038 = vmatprep.mubr.msk.bf16.mxu1 %vm655_vm5, %v5025_v7 }
 0x129   :  { %4039 = vmatmul.mubr.msk.bf16.gmra.mrb[28].mxu1 %vm655_vm5, %v5087_v17 }
 0x12a   :  { %4042 = vmatprep.mubr.msk.bf16.mxu1 %vm655_vm5, %v5089_v18 }
 0x131   :  { %4043 = vmatmul.mubr.msk.bf16.gmra.mrb[32].mxu1 %vm655_vm5, %v5099_v24 }
 0x132   :  { %4052 = vmatprep.mubr.msk.bf16.mxu1 %vm655_vm5, %v4936_v61  ;;  %v1432_v61 = vsel %vm710_vm0, %v4419_v26, 0 }
 0x139   :  { %4053 = vmatmul.mubr.msk.bf16.vlgmr.msra.gmra.mrb[0].mxu1 %vm655_vm5, %v4946_v11  ;;  %v523_v11 = vpop.permute.xlu1 %522 }
 0x13a   :  { %4056 = vmatprep.mubr.msk.bf16.mxu1 %vm655_vm5, %v4954_v16  ;;  %4089 = vmatpush3.bf16.msra.mxu1 %v4417_v45  ;;  %v520_v16 = vpop.permute.xlu0 %519  ;;  %vm537_vm1 = vcmp.eq.s32.totalorder %v4871_v21, %v523_v11 }
 0x13b   :  { %4090 = vmatprep.subr.bf16.mxu1 %v4418_v25  ;;  %vm536_vm2 = vcmp.eq.s32.totalorder %v4871_v21, %v520_v16  ;;  %v3513_v38 = vsel %vm537_vm1, 1.0, %v4718_v1 }
 0x13c   :  { %v3512_v39 = vsel %vm536_vm2, 1.0, %v4718_v1  ;;  %vm174_vm2 = vcmask 408576  }
 0x13d   :  { %v526_v33 = vpop.permute.xlu1 %525  ;;  %v5170_v46 = vpack.c.bf16 %v3513_v38, %v3512_v39 }
 0x13e   :  { %4091 = vmatpush3.bf16.msra.mxu1 %v4418_v25  ;;  %v529_v34 = vpop.permute.xlu0 %528  ;;  %vm538_vm3 = vcmp.eq.s32.totalorder %v4871_v21, %v526_v33 }
 0x13f   :  { %4365 = vmatprep.subr.msk.bf16.mxu1 %vm710_vm0, %v4419_v26  ;;  %vm539_vm4 = vcmp.eq.s32.totalorder %v4871_v21, %v529_v34  ;;  %v3514_v40 = vsel %vm538_vm3, 1.0, %v4718_v1 }
 0x140   :  { %v3515_v41 = vsel %vm539_vm4, 1.0, %v4718_v1 }
 0x141   :  { %4057 = vmatmul.mubr.msk.bf16.gmra.mrb[4].mxu1 %vm655_vm5, %v4962_v22  ;;  %v5172_v47 = vpack.c.bf16 %v3515_v41, %v3514_v40  ;;  %v532_v48 = vpop.permute.xlu1 %531 }
 0x142   :  { %4060 = vmatprep.mubr.msk.bf16.mxu1 %vm655_vm5, %v4969_v27  ;;  %4093 = vmatpush3.bf16.msra.mxu1 %v1432_v61  ;;  %v535_v50 = vpop.permute.xlu0 %534  ;;  %vm540_vm6 = vcmp.eq.s32.totalorder %v4871_v21, %v532_v48  ;;  %v4429_v48 = vld [vmem:[%s5654_s2 + $0x4] ss:$8 sps:$4 sm:$0xff]  }
 0x143   :  { %4130 = vmatprep.subr.bf16.mxu1 %v4420_v28  ;;  %vm541_vm7 = vcmp.eq.s32.totalorder %v4871_v21, %v535_v50  ;;  %v3516_v53 = vsel %vm540_vm6, 1.0, %v4718_v1  ;;  %v4432_v50 = vld [vmem:[%s5654_s2 + $0x14] ss:$8 sps:$4 sm:$0xff]  }
 0x144   :  { %v3517_v54 = vsel %vm541_vm7, 1.0, %v4718_v1 }
 0x145   :  { %v5185_v57 = vpack.c.bf16 %v3517_v54, %v3516_v53  ;;  %v559_v6 = vpop.permute.xlu1 %558  ;;  %v4435_v53 = vld [vmem:[%s5654_s2 + $0x24] ss:$8 sps:$4 sm:$0xff]   ;;  %v4433_v54 = vld [vmem:[%s5654_s2 + $0x20] ss:$8 sps:$4 sm:$0xff]  }
 0x146   :  { %v562_v13 = vpop.permute.xlu0 %561  ;;  %vm575_vm9 = vcmp.eq.s32.totalorder %v4871_v21, %v559_v6 }
 0x147   :  { %vm576_vm10 = vcmp.eq.s32.totalorder %v4871_v21, %v562_v13  ;;  %v3518_v43 = vsel %vm575_vm9, 1.0, %v4718_v1 }
 0x148   :  { %v3519_v45 = vsel %vm576_vm10, 1.0, %v4718_v1 }
 0x149   :  { %4061 = vmatmul.mubr.msk.bf16.gmra.mrb[8].mxu1 %vm655_vm5, %v4978_v32  ;;  %v565_v10 = vpop.permute.xlu1 %564  ;;  %v593_v8 = vpack.c.bf16 %v3519_v45, %v3518_v43 }
 0x14a   :  { %4064 = vmatprep.mubr.msk.bf16.mxu1 %vm655_vm5, %v4985_v36  ;;  %vm577_vm11 = vcmp.eq.s32.totalorder %v4871_v21, %v565_v10  ;;  %v571_v5 = vpop.permute.xlu0 %570  ;;  %v5370_v10 = vld [vmem:[%s5656_s4] sm:$0xff] }
 0x14b   :  { %v3520_v2 = vsel %vm577_vm11, 1.0, %v4718_v1  ;;  %vm579_vm14 = vcmp.eq.s32.totalorder %v4871_v21, %v571_v5 }
 0x14c   :  { %v3522_v56 = vsel %vm579_vm14, 1.0, %v4718_v1 }
 0x14d   :  { %v568_v12 = vpop.permute.xlu1 %567 }
 0x14e   :  { %vm578_vm12 = vcmp.eq.s32.totalorder %v4871_v21, %v568_v12  ;;  %v598_v19 = vpop.permute.xlu0 %597 }
 0x14f   :  { %v3521_v3 = vsel %vm578_vm12, 1.0, %v4718_v1  ;;  %vm614_vm9 = vcmp.eq.s32.totalorder %v4871_v21, %v598_v19 }
 0x150   :  { %v594_v9 = vpack.c.bf16 %v3521_v3, %v3520_v2  ;;  %v3524_v35 = vsel %vm614_vm9, 1.0, %v4718_v1 }
 0x151   :  { %4065 = vmatmul.mubr.msk.bf16.gmra.mrb[12].mxu1 %vm655_vm5, %v4994_v44  ;;  %v574_v4 = vpop.permute.xlu1 %573 }
 0x152   :  { %4068 = vmatprep.mubr.msk.bf16.mxu1 %vm655_vm5, %v5002_v49  ;;  %vm580_vm13 = vcmp.eq.s32.totalorder %v4871_v21, %v574_v4  ;;  %v607_v25 = vpop.permute.xlu0 %606 }
 0x153   :  { %v3523_v51 = vsel %vm580_vm13, 1.0, %v4718_v1  ;;  %vm617_vm11 = vcmp.eq.s32.totalorder %v4871_v21, %v607_v25 }
 0x154   :  { %v595_v14 = vpack.c.bf16 %v3523_v51, %v3522_v56  ;;  %v3527_v38 = vsel %vm617_vm11, 1.0, %v4718_v1 }
 0x155   :  { %v601_v15 = vpop.permute.xlu1 %600 }
 0x159   :  { %4069 = vmatmul.mubr.msk.bf16.gmra.mrb[16].mxu1 %vm655_vm5, %v5010_v55  ;;  %v604_v23 = vpop.permute.xlu1 %603 }
 0x15a   :  { %4072 = vmatprep.mubr.msk.bf16.mxu1 %vm655_vm5, %v5018_v62  ;;  %vm616_vm10 = vcmp.eq.s32.totalorder %v4871_v21, %v604_v23 }
 0x15b   :  { %v3526_v37 = vsel %vm616_vm10, 1.0, %v4718_v1  ;;  %vm2464_vm10 = vcmask 392192  }
 0x15c   :  { %v633_v40 = vpack.c.bf16 %v3527_v38, %v3526_v37 }
 0x161   :  { %4073 = vmatmul.mubr.msk.bf16.gmra.mrb[20].mxu1 %vm655_vm5, %v5025_v7 }
 0x162   :  { %4076 = vmatprep.mubr.msk.bf16.mxu1 %vm655_vm5, %v5087_v17 }
 0x169   :  { %4077 = vmatmul.mubr.msk.bf16.gmra.mrb[24].mxu1 %vm655_vm5, %v5089_v18 }
 0x16a   :  { %4080 = vmatprep.mubr.msk.bf16.mxu1 %vm655_vm5, %v5099_v24 }
 0x171   :  { %4081 = vmatmul.mubr.msk.bf16.gmra.mrb[28].mxu1 %vm655_vm5, %v5170_v46 }
 0x172   :  { %4084 = vmatprep.mubr.msk.bf16.mxu1 %vm655_vm5, %v5172_v47 }
 0x179   :  { %4085 = vmatmul.mubr.msk.bf16.gmra.mrb[32].mxu1 %vm655_vm5, %v5185_v57 }
 0x17a   :  { %4094 = vmatprep.mubr.msk.bf16.mxu1 %vm655_vm5, %v4962_v22  ;;  %v1672_v22 = vsel %vm710_vm0, %v4422_v59, 0 }
 0x181   :  { %4095 = vmatmul.mubr.msk.bf16.vlgmr.msra.gmra.mrb[0].mxu1 %vm655_vm5, %v4969_v27  ;;  %v4423_v27 = vld [vmem:[%s5653_s1] sm:$0xff]  }
 0x182   :  { %4098 = vmatprep.mubr.msk.bf16.mxu1 %vm655_vm5, %v4978_v32  ;;  %4131 = vmatpush3.bf16.msra.mxu1 %v4420_v28  ;;  %v4424_v32 = vld [vmem:[%s5653_s1 + $0x8] sm:$0xff]  }
 0x183   :  { %4132 = vmatprep.subr.bf16.mxu1 %v4421_v58  ;;  %3943 = vmatpush3.bf16.msra.mxu0 %v4423_v27  ;;  %v4444_v27 = vld [vmem:[%s5654_s2 + $0x54] ss:$8 sps:$4 sm:$0xff]  }
 0x184   :  { %3944 = vmatprep.subr.bf16.mxu0 %v4718_v1 }
 0x186   :  { %4133 = vmatpush3.bf16.msra.mxu1 %v4421_v58  ;;  %v4436_v58 = vld [vmem:[%s5654_s2 + $0x30] ss:$8 sps:$4 sm:$0xff]  }
 0x187   :  { %4366 = vmatprep.subr.msk.bf16.mxu1 %vm710_vm0, %v4422_v59  ;;  %3945 = vmatpush3.bf16.msra.mxu0 %v4424_v32  ;;  %vm184_vm0 = vcmask 1040384   ;;  %v4441_v59 = vld [vmem:[%s5654_s2 + $0x44] ss:$8 sps:$4 sm:$0xff]   ;;  %v4442_v32 = vld [vmem:[%s5654_s2 + $0x50] ss:$8 sps:$4 sm:$0xff]  }
 0x188   :  { %3946 = vmatprep.subr.bf16.mxu0 %v4718_v1  ;;  %v186_v0 = vsel %vm184_vm0, %v4426_v63, 0  ;;  %vm615_vm0 = vcmp.eq.s32.totalorder %v4871_v21, %v601_v15  ;;  %v4445_v63 = vld [vmem:[%s5654_s2 + $0x60] ss:$8 sps:$4 sm:$0xff]  }
 0x189   :  { %4099 = vmatmul.mubr.msk.bf16.gmra.mrb[4].mxu1 %vm655_vm5, %v4985_v36  ;;  %v3525_v34 = vsel %vm615_vm0, 1.0, %v4718_v1 }
 0x18a   :  { %4102 = vmatprep.mubr.msk.bf16.mxu1 %vm655_vm5, %v4994_v44  ;;  %4135 = vmatpush3.bf16.msra.mxu1 %v1672_v22  ;;  %v632_v39 = vpack.c.bf16 %v3525_v34, %v3524_v35  ;;  %v4439_v22 = vld [vmem:[%s5654_s2 + $0x40] ss:$8 sps:$4 sm:$0xff]  }
 0x18b   :  { %3947 = vmatpush3.bf16.msra.mxu0 %v4425_v60  ;;  %v4447_v60 = vld [vmem:[%s5654_s2 + $0x64] ss:$8 sps:$4 sm:$0xff]  }
 0x18c   :  { %3948 = vmatprep.subr.bf16.mxu0 %v4718_v1 }
 0x18f   :  { %3949 = vmatpush3.bf16.msra.mxu0 %v186_v0  ;;  %v5364_v0 = vshrl.u32 %v112_v20, 7 }
 0x190   :  { %2081 = vmatprep.subr.bf16.mxu0 %v4429_v48 }
 0x191   :  { %4103 = vmatmul.mubr.msk.bf16.gmra.mrb[8].mxu1 %vm655_vm5, %v5002_v49  ;;  %v637_v6 = vsub.s32 0, %v5364_v0 }
 0x192   :  { %4106 = vmatprep.mubr.msk.bf16.mxu1 %vm655_vm5, %v5010_v55 }
 0x193   :  { %v5373_v45 = vrot.slane %v5370_v10, %v637_v6 }
 0x199   :  { %4107 = vmatmul.mubr.msk.bf16.gmra.mrb[12].mxu1 %vm655_vm5, %v5018_v62 }
 0x19a   :  { %4110 = vmatprep.mubr.msk.bf16.mxu1 %vm655_vm5, %v5025_v7 }
 0x1a1   :  { %4111 = vmatmul.mubr.msk.bf16.gmra.mrb[16].mxu1 %vm655_vm5, %v5087_v17 }
 0x1a2   :  { %4114 = vmatprep.mubr.msk.bf16.mxu1 %vm655_vm5, %v5089_v18 }
 0x1a9   :  { %4115 = vmatmul.mubr.msk.bf16.gmra.mrb[20].mxu1 %vm655_vm5, %v5099_v24 }
 0x1aa   :  { %4118 = vmatprep.mubr.msk.bf16.mxu1 %vm655_vm5, %v5170_v46 }
 0x1b1   :  { %4119 = vmatmul.mubr.msk.bf16.gmra.mrb[24].mxu1 %vm655_vm5, %v5172_v47 }
 0x1b2   :  { %4122 = vmatprep.mubr.msk.bf16.mxu1 %vm655_vm5, %v5185_v57 }
 0x1b9   :  { %4123 = vmatmul.mubr.msk.bf16.gmra.mrb[28].mxu1 %vm655_vm5, %v593_v8 }
 0x1ba   :  { %4126 = vmatprep.mubr.msk.bf16.mxu1 %vm655_vm5, %v594_v9 }
 0x1c1   :  { %4127 = vmatmul.mubr.msk.bf16.gmra.mrb[32].mxu1 %vm655_vm5, %v595_v14 }
 0x1c2   :  { %4136 = vmatprep.mubr.msk.bf16.mxu1 %vm655_vm5, %v4985_v36  ;;  %v610_v36 = vpop.permute.xlu1 %609 }
 0x1c3   :  { %vm618_vm12 = vcmp.eq.s32.totalorder %v4871_v21, %v610_v36 }
 0x1c4   :  { %v3528_v41 = vsel %vm618_vm12, 1.0, %v4718_v1 }
 0x1c9   :  { %4137 = vmatmul.mubr.msk.bf16.vlgmr.msra.gmra.mrb[0].mxu1 %vm655_vm5, %v4994_v44  ;;  %v613_v44 = vpop.permute.xlu0 %612 }
 0x1ca   :  { %4140 = vmatprep.mubr.msk.bf16.mxu1 %vm655_vm5, %v5002_v49  ;;  %v116_v49 = vpop.permute.xlu1 %115  ;;  %vm619_vm13 = vcmp.eq.s32.totalorder %v4871_v21, %v613_v44 }
 0x1cb   :  { %vm132_vm15 = vcmp.eq.s32.totalorder %v4871_v21, %v116_v49  ;;  %v3529_v42 = vsel %vm619_vm13, 1.0, %v4718_v1 }
 0x1ce   :  { %v122_v26 = vpop.permute.xlu1 %121 }
 0x1cf   :  { %vm134_vm3 = vcmp.eq.s32.totalorder %v4871_v21, %v122_v26 }
 0x1d1   :  { %4141 = vmatmul.mubr.msk.bf16.gmra.mrb[4].mxu1 %vm655_vm5, %v5010_v55  ;;  %v119_v55 = vpop.permute.xlu0 %118 }
 0x1d2   :  { %4144 = vmatprep.mubr.msk.bf16.mxu1 %vm655_vm5, %v5018_v62  ;;  %vm133_vm1 = vcmp.eq.s32.totalorder %v4871_v21, %v119_v55  ;;  %v3457_v62 = vsel %vm132_vm15, 1.0, %v4718_v1 }
 0x1d5   :  { %v128_v61 = vpop.permute.xlu0 %127 }
 0x1d6   :  { %vm136_vm6 = vcmp.eq.s32.totalorder %v4871_v21, %v128_v61 }
 0x1d7   :  { %v3461_v31 = vsel %vm136_vm6, 1.0, %v4718_v1 }
 0x1d9   :  { %4145 = vmatmul.mubr.msk.bf16.gmra.mrb[8].mxu1 %vm655_vm5, %v5025_v7  ;;  %v3458_v7 = vsel %vm133_vm1, 1.0, %v4718_v1  ;;  %vm2440_vm1 = vcmp.ge.s32.totalorder %v5364_v0, 2 }
 0x1da   :  { %4148 = vmatprep.mubr.msk.bf16.mxu1 %vm655_vm5, %v5087_v17  ;;  %v150_v17 = vpack.c.bf16 %v3458_v7, %v3457_v62 }
 0x1dc   :  { %3951 = vmatmul.mubr.msk.bf16.vlgmr.msra.gmra.mrb[0].mxu0 %vm174_vm2, %v150_v17 }
 0x1dd   :  { %3954 = vmatprep.mubr.msk.bf16.mxu0 %vm4729_vm8, %v4718_v1 }
 0x1e1   :  { %4149 = vmatmul.mubr.msk.bf16.gmra.mrb[12].mxu1 %vm655_vm5, %v5089_v18  ;;  %v3459_v18 = vsel %vm134_vm3, 1.0, %v4718_v1 }
 0x1e2   :  { %4152 = vmatprep.mubr.msk.bf16.mxu1 %vm655_vm5, %v5099_v24  ;;  %v125_v24 = vpop.permute.xlu1 %124 }
 0x1e3   :  { %vm135_vm4 = vcmp.eq.s32.totalorder %v4871_v21, %v125_v24 }
 0x1e4   :  { %v3460_v28 = vsel %vm135_vm4, 1.0, %v4718_v1 }
 0x1e5   :  { %v151_v11 = vpack.c.bf16 %v3460_v28, %v3459_v18 }
 0x1e6   :  { %v131_v16 = vpop.permute.xlu1 %130 }
 0x1e7   :  { %3955 = vmatmul.mubr.msk.bf16.gmra.mrb[4].mxu0 %vm174_vm2, %v151_v11  ;;  %vm137_vm7 = vcmp.eq.s32.totalorder %v4871_v21, %v131_v16 }
 0x1e8   :  { %v3462_v30 = vsel %vm137_vm7, 1.0, %v4718_v1  ;;  %3958 = vmatprep.mubr.msk.bf16.mxu0 %vm4729_vm8, %v4718_v1 }
 0x1e9   :  { %4153 = vmatmul.mubr.msk.bf16.gmra.mrb[16].mxu1 %vm655_vm5, %v5170_v46  ;;  %v152_v33 = vpack.c.bf16 %v3462_v30, %v3461_v31  ;;  %v634_v46 = vpack.c.bf16 %v3529_v42, %v3528_v41 }
 0x1ea   :  { %4156 = vmatprep.mubr.msk.bf16.mxu1 %vm655_vm5, %v5172_v47  ;;  %v4427_v47 = vld [vmem:[%s5654_s2] ss:$8 sps:$4 sm:$0xff]  }
 0x1eb   :  { %2082 = vmatpush1.bf16.msra.mxu0 %v4427_v47 }
 0x1ec   :  { %2083 = vmatprep.subr.bf16.mxu0 %v4432_v50 }
 0x1ef   :  { %3959 = vmatmul.mubr.msk.bf16.gmra.mrb[8].mxu0 %vm174_vm2, %v152_v33 }
 0x1f0   :  { %2113 = vmatprep.mubr.bf16.mxu0 %v4728_v29  ;;  %2084 = vmatpush1.bf16.msra.mxu0 %v4430_v52 }
 0x1f1   :  { %4157 = vmatmul.mubr.msk.bf16.gmra.mrb[20].mxu1 %vm655_vm5, %v5185_v57  ;;  %2085 = vmatprep.subr.bf16.mxu0 %v4435_v53  ;;  %v4438_v57 = vld [vmem:[%s5654_s2 + $0x34] ss:$8 sps:$4 sm:$0xff]  }
 0x1f2   :  { %4160 = vmatprep.mubr.msk.bf16.mxu1 %vm655_vm5, %v593_v8 }
 0x1f4   :  { %2086 = vmatpush1.bf16.msra.mxu0 %v4433_v54 }
 0x1f5   :  { %2087 = vmatprep.subr.bf16.mxu0 %v4438_v57 }
 0x1f8   :  { %2088 = vmatpush1.bf16.msra.mxu0 %v4436_v58 }
 0x1f9   :  { %4161 = vmatmul.mubr.msk.bf16.gmra.mrb[24].mxu1 %vm655_vm5, %v594_v9  ;;  %2089 = vmatprep.subr.bf16.mxu0 %v4441_v59 }
 0x1fa   :  { %4164 = vmatprep.mubr.msk.bf16.mxu1 %vm655_vm5, %v595_v14 }
 0x1fc   :  { %2090 = vmatpush1.bf16.msra.mxu0 %v4439_v22 }
 0x1fd   :  { %2091 = vmatprep.subr.bf16.mxu0 %v4444_v27 }
 0x200   :  { %2092 = vmatpush1.bf16.msra.mxu0 %v4442_v32 }
 0x201   :  { %4165 = vmatmul.mubr.msk.bf16.gmra.mrb[28].mxu1 %vm655_vm5, %v632_v39  ;;  %2093 = vmatprep.subr.bf16.mxu0 %v4447_v60 }
 0x202   :  { %4168 = vmatprep.mubr.msk.bf16.mxu1 %vm655_vm5, %v633_v40 }
 0x204   :  { %2094 = vmatpush1.bf16.msra.mxu0 %v4445_v63 }
 0x209   :  { %4169 = vmatmul.mubr.msk.bf16.gmra.mrb[32].mxu1 %vm655_vm5, %v634_v46  ;;  %vm1983_vm5 = vcmask 572416  }
 0x20a   :  { %vm5439_vm14 = vmpackc.low %vm1983_vm5, %vm1983_vm5 }
 0x29c   :  { %v4138_v12 = vpop.f32.mrb[0].mxu1 }
 0x29d   :  { %v1708_v13 = vpop.f32.mrb[1].mxu1  ;;  %v4182_v49 = vadd.f32 %v4138_v12, %v5373_v45 }
 0x29e   :  { %v4139_v43 = vpop.f32.mrb[2].mxu1  ;;  %v4183_v3 = vadd.f32 %v1708_v13, %v5373_v45 }
 0x29f   :  { %v1711_v2 = vpop.f32.mrb[3].mxu1  ;;  %v4184_v26 = vadd.f32 %v4139_v43, %v5373_v45  ;;  %v1889_v30 = vmax.f32 %v4182_v49, 0.0 }
 0x2a0   :  { %v4185_v20 = vadd.f32 %v1711_v2, %v5373_v45  ;;  %v1887_v51 = vmax.f32 %v4183_v3, 0.0 }
 0x2a1   :  { %v1890_v38 = vmax.f32 %v4184_v26, 0.0 }
 0x2a2   :  { %v1888_v19 = vmax.f32 %v4185_v20, 0.0 }
 0x2a4   :  { %v4142_v4 = vpop.f32.mrb[4].mxu1 }
 0x2a5   :  { %v4186_v5 = vadd.f32 %v4142_v4, %v5373_v45  ;;  %v1724_v8 = vpop.f32.mrb[5].mxu1 }
 0x2a6   :  { %v4143_v9 = vpop.f32.mrb[6].mxu1  ;;  %v4187_v36 = vadd.f32 %v1724_v8, %v5373_v45 }
 0x2a7   :  { %v1893_v56 = vmax.f32 %v4186_v5, 0.0  ;;  %v4188_v14 = vadd.f32 %v4143_v9, %v5373_v45  ;;  %v1727_v15 = vpop.f32.mrb[7].mxu1 }
 0x2a8   :  { %v4189_v62 = vadd.f32 %v1727_v15, %v5373_v45  ;;  %v1891_v61 = vmax.f32 %v4187_v36, 0.0 }
 0x2a9   :  { %v1923_v23 = vmax.f32 %v1887_v51, %v1893_v56  ;;  %v1894_v25 = vmax.f32 %v4188_v14, 0.0 }
 0x2aa   :  { %v1892_v34 = vmax.f32 %v4189_v62, 0.0 }
 0x2ab   :  { %v1924_v44 = vmax.f32 %v1888_v19, %v1894_v25 }
 0x2ac   :  { %v4146_v55 = vpop.f32.mrb[8].mxu1 }
 0x2ad   :  { %v4190_v7 = vadd.f32 %v4146_v55, %v5373_v45  ;;  %v1740_v17 = vpop.f32.mrb[9].mxu1 }
 0x2ae   :  { %v4191_v18 = vadd.f32 %v1740_v17, %v5373_v45  ;;  %v4147_v24 = vpop.f32.mrb[10].mxu1 }
 0x2af   :  { %v1897_v28 = vmax.f32 %v4190_v7, 0.0  ;;  %v4192_v11 = vadd.f32 %v4147_v24, %v5373_v45  ;;  %v1743_v16 = vpop.f32.mrb[11].mxu1  ;;  %v5391_v6 = vpop.f32.mrb[0].mxu0 }
 0x2b0   :  { %v1895_v31 = vmax.f32 %v4191_v18, 0.0  ;;  %v4193_v33 = vadd.f32 %v1743_v16, %v5373_v45  ;;  %v3952_v43 = vpop.f32.mrb[1].mxu0 }
 0x2b1   :  { %v1927_v35 = vmax.f32 %v1891_v61, %v1897_v28  ;;  %v1898_v37 = vmax.f32 %v4192_v11, 0.0  ;;  %v5394_v4 = vpop.f32.mrb[2].mxu0 }
 0x2b2   :  { %v1925_v39 = vmax.f32 %v1889_v30, %v1895_v31  ;;  %v1896_v40 = vmax.f32 %v4193_v33, 0.0  ;;  %v3953_v8 = vpop.f32.mrb[3].mxu0 }
 0x2b3   :  { %v1928_v41 = vmax.f32 %v1892_v34, %v1898_v37 }
 0x2b4   :  { %v1926_v42 = vmax.f32 %v1890_v38, %v1896_v40  ;;  %v4150_v46 = vpop.f32.mrb[12].mxu1 }
 0x2b5   :  { %v4194_v47 = vadd.f32 %v4150_v46, %v5373_v45  ;;  %v1756_v48 = vpop.f32.mrb[13].mxu1 }
 0x2b6   :  { %v4195_v50 = vadd.f32 %v1756_v48, %v5373_v45  ;;  %v4151_v52 = vpop.f32.mrb[14].mxu1 }
 0x2b7   :  { %v1901_v53 = vmax.f32 %v4194_v47, 0.0  ;;  %v4196_v54 = vadd.f32 %v4151_v52, %v5373_v45  ;;  %v1759_v57 = vpop.f32.mrb[15].mxu1  ;;  %v4450_v52 = vld [vmem:[%s5654_s2 + $0x74] ss:$8 sps:$4 sm:$0xff]  }
 0x2b8   :  { %v1899_v58 = vmax.f32 %v4195_v50, 0.0  ;;  %v4197_v59 = vadd.f32 %v1759_v57, %v5373_v45  ;;  %2095 = vmatprep.subr.bf16.mxu0 %v4450_v52 }
 0x2b9   :  { %v1931_v22 = vmax.f32 %v1925_v39, %v1901_v53  ;;  %v1902_v27 = vmax.f32 %v4196_v54, 0.0 }
 0x2ba   :  { %v1929_v32 = vmax.f32 %v1923_v23, %v1899_v58  ;;  %v1900_v60 = vmax.f32 %v4197_v59, 0.0  ;;  %v5399_v49 = vpop.f32.mrb[4].mxu0  ;;  %v4448_v58 = vld [vmem:[%s5654_s2 + $0x70] ss:$8 sps:$4 sm:$0xff]  }
 0x2bb   :  { %v1932_v63 = vmax.f32 %v1926_v42, %v1902_v27  ;;  %v3956_v7 = vpop.f32.mrb[5].mxu0  ;;  %2096 = vmatpush1.bf16.msra.mxu0 %v4448_v58 }
 0x2bc   :  { %v1930_v12 = vmax.f32 %v1924_v44, %v1900_v60  ;;  %v4154_v13 = vpop.f32.mrb[16].mxu1  ;;  %v5402_v18 = vpop.f32.mrb[6].mxu0 }
 0x2bd   :  { %v4198_v2 = vadd.f32 %v4154_v13, %v5373_v45  ;;  %v1772_v3 = vpop.f32.mrb[17].mxu1  ;;  %v3957_v28 = vpop.f32.mrb[7].mxu0 }
 0x2be   :  { %v4199_v20 = vadd.f32 %v1772_v3, %v5373_v45  ;;  %v4155_v5 = vpop.f32.mrb[18].mxu1 }
 0x2bf   :  { %v1905_v9 = vmax.f32 %v4198_v2, 0.0  ;;  %v4200_v51 = vadd.f32 %v4155_v5, %v5373_v45  ;;  %v1775_v56 = vpop.f32.mrb[19].mxu1 }
 0x2c0   :  { %v1903_v14 = vmax.f32 %v4199_v20, 0.0  ;;  %v4201_v15 = vadd.f32 %v1775_v56, %v5373_v45 }
 0x2c1   :  { %v1935_v19 = vmax.f32 %v1929_v32, %v1905_v9  ;;  %v1906_v23 = vmax.f32 %v4200_v51, 0.0 }
 0x2c2   :  { %v1933_v25 = vmax.f32 %v1927_v35, %v1903_v14  ;;  %v1904_v36 = vmax.f32 %v4201_v15, 0.0  ;;  %v5407_v40 = vpop.f32.mrb[8].mxu0 }
 0x2c3   :  { %v1936_v44 = vmax.f32 %v1930_v12, %v1906_v23  ;;  %v3960_v46 = vpop.f32.mrb[9].mxu0 }
 0x2c4   :  { %v1934_v55 = vmax.f32 %v1928_v41, %v1904_v36  ;;  %v4158_v62 = vpop.f32.mrb[20].mxu1  ;;  %v5410_v50 = vpop.f32.mrb[10].mxu0 }
 0x2c5   :  { %v4202_v17 = vadd.f32 %v4158_v62, %v5373_v45  ;;  %v1788_v26 = vpop.f32.mrb[21].mxu1  ;;  %v3961_v57 = vpop.f32.mrb[11].mxu0 }
 0x2c6   :  { %v4203_v24 = vadd.f32 %v1788_v26, %v5373_v45  ;;  %v4159_v61 = vpop.f32.mrb[22].mxu1 }
 0x2c7   :  { %v1909_v11 = vmax.f32 %v4202_v17, 0.0  ;;  %v4204_v16 = vadd.f32 %v4159_v61, %v5373_v45  ;;  %v1791_v30 = vpop.f32.mrb[23].mxu1 }
 0x2c8   :  { %v1907_v31 = vmax.f32 %v4203_v24, 0.0  ;;  %v4205_v33 = vadd.f32 %v1791_v30, %v5373_v45 }
 0x2c9   :  { %v1939_v34 = vmax.f32 %v1933_v25, %v1909_v11  ;;  %v1910_v35 = vmax.f32 %v4204_v16, 0.0 }
 0x2ca   :  { %v1937_v37 = vmax.f32 %v1931_v22, %v1907_v31  ;;  %v1908_v38 = vmax.f32 %v4205_v33, 0.0 }
 0x2cb   :  { %v1940_v39 = vmax.f32 %v1934_v55, %v1910_v35 }
 0x2cc   :  { %v1938_v41 = vmax.f32 %v1932_v63, %v1908_v38  ;;  %v4162_v42 = vpop.f32.mrb[24].mxu1 }
 0x2cd   :  { %v4206_v47 = vadd.f32 %v4162_v42, %v5373_v45  ;;  %v1804_v48 = vpop.f32.mrb[25].mxu1 }
 0x2ce   :  { %v4207_v53 = vadd.f32 %v1804_v48, %v5373_v45  ;;  %v4163_v54 = vpop.f32.mrb[26].mxu1 }
 0x2cf   :  { %v1913_v59 = vmax.f32 %v4206_v47, 0.0  ;;  %v4208_v22 = vadd.f32 %v4163_v54, %v5373_v45  ;;  %v1807_v27 = vpop.f32.mrb[27].mxu1 }
 0x2d0   :  { %v1911_v32 = vmax.f32 %v4207_v53, 0.0  ;;  %v4209_v60 = vadd.f32 %v1807_v27, %v5373_v45  ;;  %v4453_v27 = vld [vmem:[%s5654_s2 + $0x84] ss:$8 sps:$4 sm:$0xff]  }
 0x2d1   :  { %v1943_v63 = vmax.f32 %v1937_v37, %v1913_v59  ;;  %v1914_v12 = vmax.f32 %v4208_v22, 0.0  ;;  %2301 = vmatprep.subr.bf16.mxu0 %v4453_v27 }
 0x2d2   :  { %v1941_v13 = vmax.f32 %v1935_v19, %v1911_v32  ;;  %v1912_v43 = vmax.f32 %v4209_v60, 0.0  ;;  %v4454_v32 = vld [vmem:[%s5654_s2 + $0x90] ss:$8 sps:$4 sm:$0xff]   ;;  %v4459_v60 = vld [vmem:[%s5654_s2 + $0xa4] ss:$8 sps:$4 sm:$0xff]  }
 0x2d3   :  { %v1944_v2 = vmax.f32 %v1938_v41, %v1914_v12  ;;  %v4462_v12 = vld [vmem:[%s5654_s2 + $0xb4] ss:$8 sps:$4 sm:$0xff]  }
 0x2d4   :  { %v1942_v3 = vmax.f32 %v1936_v44, %v1912_v43  ;;  %v4166_v20 = vpop.f32.mrb[28].mxu1  ;;  %v4465_v43 = vld [vmem:[%s5654_s2 + $0xc4] ss:$8 sps:$4 sm:$0xff]  }
 0x2d5   :  { %v4210_v5 = vadd.f32 %v4166_v20, %v5373_v45  ;;  %v1820_v8 = vpop.f32.mrb[29].mxu1  ;;  %v4466_v20 = vld [vmem:[%s5654_s2 + $0xd0] ss:$8 sps:$4 sm:$0xff]  }
 0x2d6   :  { %v4211_v9 = vadd.f32 %v1820_v8, %v5373_v45  ;;  %v4167_v51 = vpop.f32.mrb[30].mxu1  ;;  %v4469_v8 = vld [vmem:[%s5654_s2 + $0xe0] ss:$8 sps:$4 sm:$0xff]  }
 0x2d7   :  { %v1917_v56 = vmax.f32 %v4210_v5, 0.0  ;;  %v4212_v14 = vadd.f32 %v4167_v51, %v5373_v45  ;;  %v1823_v15 = vpop.f32.mrb[31].mxu1  ;;  %v4471_v5 = vld [vmem:[%s5654_s2 + $0xe4] ss:$8 sps:$4 sm:$0xff]   ;;  %v4472_v51 = vld [vmem:[%s5654_s2 + $0xf0] ss:$8 sps:$4 sm:$0xff]  }
 0x2d8   :  { %v1915_v23 = vmax.f32 %v4211_v9, 0.0  ;;  %v4213_v25 = vadd.f32 %v1823_v15, %v5373_v45  ;;  %v4474_v9 = vld [vmem:[%s5654_s2 + $0xf4] ss:$8 sps:$4 sm:$0xff]  }
 0x2d9   :  { %v1947_v36 = vmax.f32 %v1941_v13, %v1917_v56  ;;  %v1918_v55 = vmax.f32 %v4212_v14, 0.0  ;;  %v4460_v13 = vld [vmem:[%s5654_s2 + $0xb0] ss:$8 sps:$4 sm:$0xff]   ;;  %v1995_v56 = vsub.s32 1, %v5364_v0  ;;  %v5527_v14 = vld [vmem:[%s5656_s4 + $0x8] sm:$0xff] }
 0x2da   :  { %v1945_v19 = vmax.f32 %v1939_v34, %v1915_v23  ;;  %v1916_v62 = vmax.f32 %v4213_v25, 0.0 }
 0x2db   :  { %v1948_v7 = vmax.f32 %v1942_v3, %v1918_v55  ;;  %1959 = vrot.lane.b32.xlu0 %v1947_v36, %s4730_s20  ;;  %v4468_v3 = vld [vmem:[%s5654_s2 + $0xd4] ss:$8 sps:$4 sm:$0xff]   ;;  %v2000_v15 = vrot.slane %v5527_v14, %v1995_v56 }
 0x2dc   :  { %v1946_v44 = vmax.f32 %v1940_v39, %v1916_v62  ;;  %v4170_v17 = vpop.f32.mrb[32].mxu1 }
 0x2dd   :  { %v4214_v26 = vadd.f32 %v4170_v17, %v5373_v45  ;;  %1961 = vrot.lane.b32.xlu1 %v1948_v7, %s4730_s20  ;;  %v1836_v24 = vpop.f32.mrb[33].mxu1 }
 0x2de   :  { %v4215_v61 = vadd.f32 %v1836_v24, %v5373_v45  ;;  %v4171_v28 = vpop.f32.mrb[34].mxu1 }
 0x2df   :  { %v1921_v11 = vmax.f32 %v4214_v26, 0.0  ;;  %v4216_v16 = vadd.f32 %v4171_v28, %v5373_v45  ;;  %v1839_v30 = vpop.f32.mrb[35].mxu1 }
 0x2e0   :  { %v1919_v31 = vmax.f32 %v4215_v61, 0.0  ;;  %v4217_v33 = vadd.f32 %v1839_v30, %v5373_v45 }
 0x2e1   :  { %v1951_v34 = vmax.f32 %v1945_v19, %v1921_v11  ;;  %v1922_v35 = vmax.f32 %v4216_v16, 0.0 }
 0x2e2   :  { %v1949_v37 = vmax.f32 %v1943_v63, %v1919_v31  ;;  %v1920_v38 = vmax.f32 %v4217_v33, 0.0  ;;  %v4457_v63 = vld [vmem:[%s5654_s2 + $0xa0] ss:$8 sps:$4 sm:$0xff]  }
 0x2e3   :  { %v1952_v39 = vmax.f32 %v1946_v44, %v1922_v35 }
 0x2e4   :  { %v1950_v41 = vmax.f32 %v1944_v2, %v1920_v38  ;;  %1963 = vrot.lane.b32.xlu0 %v1949_v37, %s4730_s20  ;;  %v4463_v2 = vld [vmem:[%s5654_s2 + $0xc0] ss:$8 sps:$4 sm:$0xff]  }
 0x2e6   :  { %1965 = vrot.lane.b32.xlu1 %v1950_v41, %s4730_s20 }
 0x2e8   :  { %1967 = vrot.lane.b32.xlu0 %v1951_v34, %s4730_s20 }
 0x2ea   :  { %1969 = vrot.lane.b32.xlu1 %v1952_v39, %s4730_s20 }
 0x34d   :  { %v1960_v42 = vpop.permute.xlu0 %1959 }
 0x34e   :  { %v5431_v47 = vsel %vm174_vm2, %v5391_v6, %v1960_v42  ;;  %v1996_v42 = vrot.slane %v5370_v10, %v1995_v56 }
 0x34f   :  { %v1962_v46 = vpop.permute.xlu1 %1961 }
 0x350   :  { %v5435_v45 = vsel %vm174_vm2, %v5394_v4, %v1962_v46 }
 0x351   :  { %v3652_v52 = vpack.c.bf16 %v5435_v45, %v5431_v47 }
 0x353   :  { %3653 = vmatmul.mubr.msk.bf16.vlgmr.msra.gmra.mrb[12].mxu0 %vm5439_vm14, %v3652_v52 }
 0x354   :  { %2123 = vmatprep.mubr.bf16.mxu0 %v4728_v29 }
 0x356   :  { %v1964_v6 = vpop.permute.xlu0 %1963 }
 0x357   :  { %v5450_v4 = vsel %vm174_vm2, %v5399_v49, %v1964_v6 }
 0x358   :  { %v1966_v53 = vpop.permute.xlu1 %1965 }
 0x359   :  { %v5454_v54 = vsel %vm174_vm2, %v5402_v18, %v1966_v53 }
 0x35a   :  { %v3655_v57 = vpack.c.bf16 %v5454_v54, %v5450_v4  ;;  %v1968_v58 = vpop.permute.xlu0 %1967 }
 0x35b   :  { %v5462_v22 = vsel %vm174_vm2, %v5407_v40, %v1968_v58  ;;  %v4451_v40 = vld [vmem:[%s5654_s2 + $0x80] ss:$8 sps:$4 sm:$0xff]  }
 0x35c   :  { %v1970_v59 = vpop.permute.xlu1 %1969  ;;  %3656 = vmatmul.mubr.msk.bf16.gmra.mrb[16].mxu0 %vm5439_vm14, %v3655_v57 }
 0x35d   :  { %v5466_v49 = vsel %vm174_vm2, %v5410_v50, %v1970_v59  ;;  %2133 = vmatprep.mubr.bf16.mxu0 %v4728_v29  ;;  %2302 = vmatpush1.bf16.msra.mxu0 %v4451_v40  ;;  %v4456_v50 = vld [vmem:[%s5654_s2 + $0x94] ss:$8 sps:$4 sm:$0xff]  }
 0x35e   :  { %v3658_v18 = vpack.c.bf16 %v5466_v49, %v5462_v22  ;;  %2303 = vmatprep.subr.bf16.mxu0 %v4456_v50 }
 0x361   :  { %2304 = vmatpush1.bf16.msra.mxu0 %v4454_v32 }
 0x362   :  { %2305 = vmatprep.subr.bf16.mxu0 %v4459_v60 }
 0x364   :  { %3659 = vmatmul.mubr.msk.bf16.gmra.mrb[20].mxu0 %vm5439_vm14, %v3658_v18 }
 0x365   :  { %2333 = vmatprep.mubr.bf16.mxu0 %v4728_v29  ;;  %2306 = vmatpush1.bf16.msra.mxu0 %v4457_v63 }
 0x366   :  { %2307 = vmatprep.subr.bf16.mxu0 %v4462_v12 }
 0x369   :  { %2308 = vmatpush1.bf16.msra.mxu0 %v4460_v13  ;;  %v1984_v13 = vsel %vm1983_vm5, %v5431_v47, 0.0 }
 0x36a   :  { %2309 = vmatprep.subr.bf16.mxu0 %v4465_v43 }
 0x36d   :  { %2310 = vmatpush1.bf16.msra.mxu0 %v4463_v2 }
 0x36e   :  { %2311 = vmatprep.subr.bf16.mxu0 %v4468_v3 }
 0x371   :  { %2312 = vmatpush1.bf16.msra.mxu0 %v4466_v20 }
 0x372   :  { %2313 = vmatprep.subr.bf16.mxu0 %v4471_v5  ;;  %v1985_v5 = vsel %vm1983_vm5, %v5435_v45, 0.0 }
 0x375   :  { %2314 = vmatpush1.bf16.msra.mxu0 %v4469_v8 }
 0x376   :  { %2315 = vmatprep.subr.bf16.mxu0 %v4474_v9 }
 0x379   :  { %2316 = vmatpush1.bf16.msra.mxu0 %v4472_v51 }
 0x37a   :  { %4172 = vmatprep.subr.bf16.mxu0 %v4718_v1 }
 0x426   :  { %v2115_v23 = vpop.f32.mrb[12].mxu0 }
 0x427   :  { %v2117_v25 = vpop.f32.mrb[13].mxu0  ;;  %v2116_v53 = vadd.f32 %v2115_v23, %v1996_v42 }
 0x428   :  { %v2118_v36 = vadd.f32 %v2117_v25, %v2000_v15  ;;  %v2119_v55 = vpop.f32.mrb[14].mxu0 }
 0x429   :  { %v2121_v19 = vpop.f32.mrb[15].mxu0  ;;  %v2120_v58 = vadd.f32 %v2119_v55, %v1996_v42  ;;  %v2144_v27 = vmax.f32 %v2116_v53, 0.0 }
 0x42a   :  { %v3660_v62 = vmul.f32 -1.442695, %v2118_v36  ;;  %v2122_v7 = vadd.f32 %v2121_v19, %v2000_v15 }
 0x42b   :  { %v2145_v63 = vmax.f32 %v2120_v58, 0.0 }
 0x42c   :  { %4635 = vpow2.f32 %v3660_v62  ;;  %v3661_v44 = vmul.f32 -1.442695, %v2122_v7 }
 0x42e   :  { %4637 = vpow2.f32 %v3661_v44 }
 0x42f   :  { %v2125_v17 = vpop.f32.mrb[16].mxu0 }
 0x430   :  { %v2127_v26 = vpop.f32.mrb[17].mxu0  ;;  %v2126_v8 = vadd.f32 %v2125_v17, %v1996_v42  ;;  %v1986_v17 = vsel %vm1983_vm5, %v5450_v4, 0.0 }
 0x431   :  { %v2128_v24 = vadd.f32 %v2127_v26, %v2000_v15  ;;  %v2129_v61 = vpop.f32.mrb[18].mxu0 }
 0x432   :  { %v2131_v28 = vpop.f32.mrb[19].mxu0  ;;  %v2130_v23 = vadd.f32 %v2129_v61, %v1996_v42  ;;  %v2146_v55 = vmax.f32 %v2126_v8, 0.0 }
 0x433   :  { %v3662_v11 = vmul.f32 -1.442695, %v2128_v24  ;;  %v2132_v16 = vadd.f32 %v2131_v28, %v2000_v15 }
 0x434   :  { %v2147_v62 = vmax.f32 %v2130_v23, 0.0 }
 0x435   :  { %4639 = vpow2.f32 %v3662_v11  ;;  %v3663_v30 = vmul.f32 -1.442695, %v2132_v16  ;;  %v1987_v11 = vsel %vm1983_vm5, %v5454_v54, 0.0 }
 0x436   :  { %v4636_v31 = vpop.eup %4635 }
 0x437   :  { %v2168_v33 = vadd.f32 1.0, %v4636_v31  ;;  %4641 = vpow2.f32 %v3663_v30  ;;  %v2135_v34 = vpop.f32.mrb[20].mxu0 }
 0x438   :  { %v4638_v35 = vpop.eup %4637  ;;  %v2137_v37 = vpop.f32.mrb[21].mxu0  ;;  %v2136_v26 = vadd.f32 %v2135_v34, %v1996_v42 }
 0x439   :  { %4643 = vrcp.f32 %v2168_v33  ;;  %v2169_v38 = vadd.f32 1.0, %v4638_v35  ;;  %v2138_v39 = vadd.f32 %v2137_v37, %v2000_v15  ;;  %v2139_v41 = vpop.f32.mrb[22].mxu0 }
 0x43a   :  { %v2141_v46 = vpop.f32.mrb[23].mxu0  ;;  %v2140_v16 = vadd.f32 %v2139_v41, %v1996_v42  ;;  %v2148_v33 = vmax.f32 %v2136_v26, 0.0 }
 0x43b   :  { %4645 = vrcp.f32 %v2169_v38  ;;  %v3664_v48 = vmul.f32 -1.442695, %v2138_v39  ;;  %v2142_v52 = vadd.f32 %v2141_v46, %v2000_v15 }
 0x43c   :  { %v2149_v38 = vmax.f32 %v2140_v16, 0.0 }
 0x43d   :  { %4647 = vpow2.f32 %v3664_v48  ;;  %v3665_v6 = vmul.f32 -1.442695, %v2142_v52  ;;  %v1988_v48 = vsel %vm1983_vm5, %v5462_v22, 0.0  ;;  %v1989_v52 = vsel %vm1983_vm5, %v5466_v49, 0.0 }
 0x43e   :  { %v2215_v22 = vsub.s32 2, %v5364_v0 }
 0x43f   :  { %v4640_v57 = vpop.eup %4639  ;;  %4649 = vpow2.f32 %v3665_v6 }
 0x440   :  { %v2170_v59 = vadd.f32 1.0, %v4640_v57 }
 0x441   :  { %v4642_v18 = vpop.eup %4641 }
 0x442   :  { %4651 = vrcp.f32 %v2170_v59  ;;  %v2171_v40 = vadd.f32 1.0, %v4642_v18  ;;  %v2220_v59 = vrot.slane %v5527_v14, %v2215_v22 }
 0x443   :  { %v4644_v50 = vpop.eup %4643 }
 0x444   :  { %v2186_v32 = vmul.f32 %v4644_v50, %v2144_v27  ;;  %v2192_v60 = vsub.f32 1.0, %v4644_v50  ;;  %4653 = vrcp.f32 %v2171_v40 }
 0x445   :  { %v4646_v12 = vpop.eup %4645 }
 0x446   :  { %v2187_v43 = vmul.f32 %v4646_v12, %v2145_v63  ;;  %v2193_v2 = vsub.f32 1.0, %v4646_v12  ;;  %v2198_v3 = vmul.f32 %v2192_v60, %v1984_v13 }
 0x447   :  { %v4648_v20 = vpop.eup %4647 }
 0x448   :  { %v2172_v9 = vadd.f32 1.0, %v4648_v20  ;;  %v2199_v51 = vmul.f32 %v2193_v2, %v1985_v5  ;;  %v5535_v56 = vadd.f32 %v2198_v3, %v2186_v32 }
 0x449   :  { %v4650_v15 = vpop.eup %4649 }
 0x44a   :  { %4655 = vrcp.f32 %v2172_v9  ;;  %v2173_v25 = vadd.f32 1.0, %v4650_v15  ;;  %v5537_v36 = vadd.f32 %v2199_v51, %v2187_v43 }
 0x44c   :  { %v4652_v47 = vpop.eup %4651  ;;  %4657 = vrcp.f32 %v2173_v25  ;;  %v2210_v19 = vpack.c.bf16 %v5537_v36, %v5535_v56 }
 0x44d   :  { %v2188_v7 = vmul.f32 %v4652_v47, %v2146_v55  ;;  %v2194_v45 = vsub.f32 1.0, %v4652_v47 }
 0x44e   :  { %v4654_v44 = vpop.eup %4653  ;;  %2334 = vmatmul.mubr.bf16.vlgmr.msra.gmra.mrb[24].mxu0 %v2210_v19  ;;  %v5572_v19 = vrot.slane %v5370_v10, %v2215_v22 }
 0x44f   :  { %2343 = vmatprep.mubr.bf16.mxu0 %v4728_v29  ;;  %v2189_v24 = vmul.f32 %v4654_v44, %v2147_v62  ;;  %v2195_v61 = vsub.f32 1.0, %v4654_v44  ;;  %v2200_v28 = vmul.f32 %v2194_v45, %v1986_v17  ;;  %v3688_v44 = vadd.s32 4294967294, %v5364_v0 }
 0x451   :  { %v2201_v30 = vmul.f32 %v2195_v61, %v1987_v11  ;;  %v5546_v31 = vadd.f32 %v2200_v28, %v2188_v7  ;;  %v2446_v61 = vadd.s32 1, %v3688_v44 }
 0x453   :  { %v5548_v35 = vadd.f32 %v2201_v30, %v2189_v24 }
 0x454   :  { %v4656_v37 = vpop.eup %4655 }
 0x455   :  { %v2211_v4 = vpack.c.bf16 %v5548_v35, %v5546_v31  ;;  %v2190_v34 = vmul.f32 %v4656_v37, %v2148_v33  ;;  %v2196_v39 = vsub.f32 1.0, %v4656_v37  ;;  %v2442_v33 = vmul.u32 16, %v3688_v44 }
 0x456   :  { %v4658_v46 = vpop.eup %4657 }
 0x457   :  { %2344 = vmatmul.mubr.bf16.gmra.mrb[28].mxu0 %v2211_v4  ;;  %v2191_v54 = vmul.f32 %v4658_v46, %v2149_v38  ;;  %v2197_v41 = vsub.f32 1.0, %v4658_v46  ;;  %v2202_v42 = vmul.f32 %v2196_v39, %v1988_v48  ;;  %v2436_v38 = vadd.s32 1, %v5364_v0 }
 0x458   :  { %2353 = vmatprep.mubr.bf16.mxu0 %v4728_v29  ;;  %v2447_v4 = vmul.u32 16, %v2446_v61 }
 0x459   :  { %v2203_v6 = vmul.f32 %v2197_v41, %v1989_v52  ;;  %v5557_v53 = vadd.f32 %v2202_v42, %v2190_v34 }
 0x45b   :  { %v5559_v57 = vadd.f32 %v2203_v6, %v2191_v54  ;;  %v2433_v54 = vmul.u32 8, %v5364_v0  ;;  %v2443_v6 = vadd.s32 16, %v2442_v33  ;;  %v4477_v33 = vld [vmem:[#allocation2 + $0x4] ss:$28 sps:$4 sm:$0xff]  }
 0x45d   :  { %v2212_v58 = vpack.c.bf16 %v5559_v57, %v5557_v53  ;;  %vm2434_vm15 = vcmp.ge.s32.totalorder %v4871_v21, %v2433_v54  ;;  %vm2444_vm2 = vcmp.ge.s32.totalorder %v4871_v21, %v2443_v6  ;;  %v4487_v54 = vld [vmem:[#allocation2 + $0xe0] ss:$28 sps:$4 sm:$0xff]   ;;  %v4493_v6 = vld [vmem:[#allocation2 + $0x150] ss:$28 sps:$4 sm:$0xff]  }
 0x45e   :  { %vm2445_vm6 = vmand %vm2440_vm1, %vm2444_vm2 }
 0x45f   :  { %2354 = vmatmul.mubr.bf16.gmra.mrb[32].mxu0 %v2212_v58 }
 0x460   :  { %4178 = vmatprep.mubr.msk.bf16.mxu0 %vm4729_vm8, %v4718_v1  ;;  %vm2432_vm8 = vcmp.lt.s32.totalorder %v5364_v0, 2 }
 0x461   :  { %vm5587_vm3 = vmand %vm2432_vm8, %vm2434_vm15 }
 0x521   :  { %v2335_v18 = vpop.f32.mrb[24].mxu0 }
 0x522   :  { %v2337_v49 = vpop.f32.mrb[25].mxu0  ;;  %v2336_v26 = vadd.f32 %v2335_v18, %v5572_v19 }
 0x523   :  { %v2338_v27 = vadd.f32 %v2337_v49, %v2220_v59  ;;  %v2339_v29 = vpop.f32.mrb[26].mxu0 }
 0x524   :  { %v2341_v40 = vpop.f32.mrb[27].mxu0  ;;  %v2340_v28 = vadd.f32 %v2339_v29, %v5572_v19  ;;  %v2364_v30 = vmax.f32 %v2336_v26, 0.0  ;;  %v2448_v29 = vadd.s32 16, %v2447_v4  ;;  %v4475_v4 = vld [vmem:[#allocation2] ss:$28 sps:$4 sm:$0xff]  }
 0x525   :  { %v3682_v50 = vmul.f32 -1.442695, %v2338_v27  ;;  %v2342_v32 = vadd.f32 %v2341_v40, %v2220_v59 }
 0x526   :  { %v2365_v34 = vmax.f32 %v2340_v28, 0.0  ;;  %vm2449_vm7 = vcmp.lt.s32.totalorder %v4871_v21, %v2448_v29  ;;  %v4507_v29 = vld [vmem:[#allocation2 + $0x234] ss:$28 sps:$4 sm:$0xff]  }
 0x527   :  { %4659 = vpow2.f32 %v3682_v50  ;;  %v3683_v60 = vmul.f32 -1.442695, %v2342_v32  ;;  %vm2450_vm9 = vmand %vm2445_vm6, %vm2449_vm7 }
 0x529   :  { %4661 = vpow2.f32 %v3683_v60 }
 0x52a   :  { %v2345_v63 = vpop.f32.mrb[28].mxu0 }
 0x52b   :  { %v2347_v12 = vpop.f32.mrb[29].mxu0  ;;  %v2346_v22 = vadd.f32 %v2345_v63, %v5572_v19 }
 0x52c   :  { %v2348_v13 = vadd.f32 %v2347_v12, %v2220_v59  ;;  %v2349_v43 = vpop.f32.mrb[30].mxu0  ;;  %v4519_v12 = vld [vmem:[#allocation2 + $0x314] ss:$28 sps:$4 sm:$0xff]  }
 0x52d   :  { %v2351_v2 = vpop.f32.mrb[31].mxu0  ;;  %v2350_v50 = vadd.f32 %v2349_v43, %v5572_v19  ;;  %v2366_v60 = vmax.f32 %v2346_v22, 0.0  ;;  %v4496_v22 = vld [vmem:[#allocation2 + $0x188] ss:$28 sps:$4 sm:$0xff]  }
 0x52e   :  { %v3684_v3 = vmul.f32 -1.442695, %v2348_v13  ;;  %v2352_v20 = vadd.f32 %v2351_v2, %v2220_v59  ;;  %v4517_v13 = vld [vmem:[#allocation2 + $0x310] ss:$28 sps:$4 sm:$0xff]  }
 0x52f   :  { %v2367_v43 = vmax.f32 %v2350_v50, 0.0  ;;  %v4510_v50 = vld [vmem:[#allocation2 + $0x26c] ss:$28 sps:$4 sm:$0xff]  }
 0x530   :  { %4663 = vpow2.f32 %v3684_v3  ;;  %v3685_v5 = vmul.f32 -1.442695, %v2352_v20 }
 0x531   :  { %v4660_v8 = vpop.eup %4659 }
 0x532   :  { %v2388_v9 = vadd.f32 1.0, %v4660_v8  ;;  %4665 = vpow2.f32 %v3685_v5  ;;  %v5567_v51 = vpop.f32.mrb[32].mxu0 }
 0x533   :  { %v4662_v15 = vpop.eup %4661  ;;  %v2357_v23 = vpop.f32.mrb[33].mxu0  ;;  %v2356_v5 = vadd.f32 %v5567_v51, %v5572_v19 }
 0x534   :  { %4667 = vrcp.f32 %v2388_v9  ;;  %v2389_v25 = vadd.f32 1.0, %v4662_v15  ;;  %v2358_v55 = vadd.f32 %v2357_v23, %v2220_v59  ;;  %v5569_v47 = vpop.f32.mrb[34].mxu0 }
 0x535   :  { %v2361_v62 = vpop.f32.mrb[35].mxu0 }
 0x536   :  { %4669 = vrcp.f32 %v2389_v25  ;;  %v3686_v7 = vmul.f32 -1.442695, %v2358_v55  ;;  %v2362_v45 = vadd.f32 %v2361_v62, %v2220_v59  ;;  %v2437_v59 = vmul.u32 8, %v2436_v38 }
 0x537   :  { %v2368_v55 = vmax.f32 %v2356_v5, 0.0 }
 0x538   :  { %4671 = vpow2.f32 %v3686_v7  ;;  %v3687_v17 = vmul.f32 -1.442695, %v2362_v45  ;;  %vm5592_vm4 = vcmp.lt.s32.totalorder %v4871_v21, %v2437_v59  ;;  %v2360_v21 = vadd.f32 %v5569_v47, %v5572_v19  ;;  %v4501_v59 = vld [vmem:[#allocation2 + $0x1c4] ss:$28 sps:$4 sm:$0xff]  }
 0x539   :  { %vm2439_vm0 = vmand %vm5587_vm3, %vm5592_vm4  ;;  %v3690_v7 = vsel %vm2450_vm9, 1.0, %v4718_v1 }
 0x53a   :  { %v4664_v24 = vpop.eup %4663  ;;  %4673 = vpow2.f32 %v3687_v17  ;;  %v3689_v62 = vsel %vm2439_vm0, 1.0, %v4718_v1  ;;  %v2458_v28 = vmul.f32 0.0625, %v3690_v7  ;;  %v4529_v7 = vld [vmem:[#allocation2 + $0x78] ss:$28 sps:$4 sm:$0xff]  }
 0x53b   :  { %v2390_v11 = vadd.f32 1.0, %v4664_v24  ;;  %v2454_v61 = vmul.f32 0.125, %v3689_v62  ;;  %v4531_v62 = vld [vmem:[#allocation2 + $0x7c] ss:$28 sps:$4 sm:$0xff]  }
 0x53c   :  { %v4666_v16 = vpop.eup %4665 }
 0x53d   :  { %4675 = vrcp.f32 %v2390_v11  ;;  %v2391_v10 = vadd.f32 1.0, %v4666_v16 }
 0x53e   :  { %v4668_v37 = vpop.eup %4667 }
 0x53f   :  { %4677 = vrcp.f32 %v2391_v10  ;;  %v2406_v39 = vmul.f32 %v4668_v37, %v2364_v30  ;;  %v2412_v46 = vsub.f32 1.0, %v4668_v37  ;;  %v2459_v30 = vadd.f32 %v2458_v28, %v2454_v61  ;;  %v4543_v61 = vld [vmem:[#allocation2 + $0x15c] ss:$28 sps:$4 sm:$0xff]  }
 0x540   :  { %v4670_v48 = vpop.eup %4669  ;;  %v4541_v28 = vld [vmem:[#allocation2 + $0x158] ss:$28 sps:$4 sm:$0xff]  }
 0x541   :  { %v2407_v41 = vmul.f32 %v4670_v48, %v2365_v34  ;;  %v2413_v42 = vsub.f32 1.0, %v4670_v48  ;;  %v2418_v52 = vmul.f32 %v2412_v46, %v5535_v56  ;;  %v2460_v38 = vpack.c.bf16 %v2459_v30, %v2459_v30  ;;  %v4480_v34 = vld [vmem:[#allocation2 + $0x3c] ss:$28 sps:$4 sm:$0xff]   ;;  %v4484_v46 = vld [vmem:[#allocation2 + $0xa8] ss:$28 sps:$4 sm:$0xff]  }
 0x542   :  { %v4672_v58 = vpop.eup %4671  ;;  %v4489_v48 = vld [vmem:[#allocation2 + $0xe4] ss:$28 sps:$4 sm:$0xff]  }
 0x543   :  { %v2392_v18 = vadd.f32 1.0, %v4672_v58  ;;  %v2419_v49 = vmul.f32 %v2413_v42, %v5537_v36  ;;  %v2424_v27 = vadd.f32 %v2418_v52, %v2406_v39  ;;  %v4478_v39 = vld [vmem:[#allocation2 + $0x38] ss:$28 sps:$4 sm:$0xff]   ;;  %v4498_v58 = vld [vmem:[#allocation2 + $0x18c] ss:$28 sps:$4 sm:$0xff]  }
 0x544   :  { %v4674_v40 = vpop.eup %4673  ;;  %v4490_v42 = vld [vmem:[#allocation2 + $0x118] ss:$28 sps:$4 sm:$0xff]   ;;  %v4550_v30 = vld [vmem:[#allocation2 + $0x200] ss:$28 sps:$4 sm:$0xff]  }
 0x545   :  { %4679 = vrcp.f32 %v2392_v18  ;;  %v2393_v56 = vadd.f32 1.0, %v4674_v40  ;;  %v2425_v32 = vadd.f32 %v2419_v49, %v2407_v41  ;;  %v4492_v41 = vld [vmem:[#allocation2 + $0x11c] ss:$28 sps:$4 sm:$0xff]   ;;  %v4495_v52 = vld [vmem:[#allocation2 + $0x154] ss:$28 sps:$4 sm:$0xff]  }
 0x546   :  { %v4499_v18 = vld [vmem:[#allocation2 + $0x1c0] ss:$28 sps:$4 sm:$0xff]   ;;  %v4505_v40 = vld [vmem:[#allocation2 + $0x230] ss:$28 sps:$4 sm:$0xff]  }
 0x547   :  { %v4676_v63 = vpop.eup %4675  ;;  %4681 = vrcp.f32 %v2393_v56  ;;  %v2461_v36 = vpack.c.bf16 %v2425_v32, %v2424_v27  ;;  %v4504_v49 = vld [vmem:[#allocation2 + $0x1fc] ss:$28 sps:$4 sm:$0xff]   ;;  %v4508_v56 = vld [vmem:[#allocation2 + $0x268] ss:$28 sps:$4 sm:$0xff]  }
 0x548   :  { %v2408_v2 = vmul.f32 %v4676_v63, %v2366_v60  ;;  %v2414_v3 = vsub.f32 1.0, %v4676_v63  ;;  %v4502_v27 = vld [vmem:[#allocation2 + $0x1f8] ss:$28 sps:$4 sm:$0xff]   ;;  %v4513_v32 = vld [vmem:[#allocation2 + $0x2a4] ss:$28 sps:$4 sm:$0xff]  }
 0x549   :  { %v4678_v20 = vpop.eup %4677  ;;  %4173 = vmatpush3.bf16.msra.mxu0 %v2461_v36  ;;  %v4511_v60 = vld [vmem:[#allocation2 + $0x2a0] ss:$28 sps:$4 sm:$0xff]   ;;  %v4514_v36 = vld [vmem:[#allocation2 + $0x2d8] ss:$28 sps:$4 sm:$0xff]  }
 0x54a   :  { %4174 = vmatprep.subr.bf16.mxu0 %v4718_v1  ;;  %v2409_v8 = vmul.f32 %v4678_v20, %v2367_v43  ;;  %v2415_v9 = vsub.f32 1.0, %v4678_v20  ;;  %v2420_v15 = vmul.f32 %v2414_v3, %v5546_v31  ;;  %v2369_v31 = vmax.f32 %v2360_v21, 0.0  ;;  %v4516_v63 = vld [vmem:[#allocation2 + $0x2dc] ss:$28 sps:$4 sm:$0xff]   ;;  %v4522_v43 = vld [vmem:[#allocation2 + $0x34c] ss:$28 sps:$4 sm:$0xff]  }
 0x54b   :  { %v4525_v3 = vld [vmem:[#allocation2 + $0xc] ss:$28 sps:$4 sm:$0xff]  }
 0x54c   :  { %v2421_v23 = vmul.f32 %v2415_v9, %v5548_v35  ;;  %v2426_v25 = vadd.f32 %v2420_v15, %v2408_v2  ;;  %v4520_v2 = vld [vmem:[#allocation2 + $0x348] ss:$28 sps:$4 sm:$0xff]  }
 0x54e   :  { %v2427_v51 = vadd.f32 %v2421_v23, %v2409_v8  ;;  %v4523_v23 = vld [vmem:[#allocation2 + $0x8] ss:$28 sps:$4 sm:$0xff]  }
 0x54f   :  { %v4680_v45 = vpop.eup %4679 }
 0x550   :  { %v2462_v44 = vpack.c.bf16 %v2427_v51, %v2426_v25  ;;  %v2410_v17 = vmul.f32 %v4680_v45, %v2368_v55  ;;  %v2416_v26 = vsub.f32 1.0, %v4680_v45  ;;  %v4528_v55 = vld [vmem:[#allocation2 + $0x44] ss:$28 sps:$4 sm:$0xff]   ;;  %v4534_v45 = vld [vmem:[#allocation2 + $0xb4] ss:$28 sps:$4 sm:$0xff]  }
 0x551   :  { %v4682_v24 = vpop.eup %4681  ;;  %v4526_v51 = vld [vmem:[#allocation2 + $0x40] ss:$28 sps:$4 sm:$0xff]  }
 0x552   :  { %4175 = vmatpush3.bf16.msra.mxu0 %v2462_v44  ;;  %v2411_v11 = vmul.f32 %v4682_v24, %v2369_v31  ;;  %v2417_v47 = vsub.f32 1.0, %v4682_v24  ;;  %v2422_v35 = vmul.f32 %v2416_v26, %v5557_v53  ;;  %v4483_v53 = vld [vmem:[#allocation2 + $0x74] ss:$28 sps:$4 sm:$0xff]   ;;  %v4537_v44 = vld [vmem:[#allocation2 + $0xec] ss:$28 sps:$4 sm:$0xff]  }
 0x553   :  { %4176 = vmatprep.subr.bf16.mxu0 %v4718_v1  ;;  %v4481_v1 = vld [vmem:[#allocation2 + $0x70] ss:$28 sps:$4 sm:$0xff]   ;;  %v4540_v26 = vld [vmem:[#allocation2 + $0x124] ss:$28 sps:$4 sm:$0xff]  }
 0x554   :  { %v2423_v19 = vmul.f32 %v2417_v47, %v5559_v57  ;;  %v2428_v16 = vadd.f32 %v2422_v35, %v2410_v17  ;;  %v4486_v57 = vld [vmem:[#allocation2 + $0xac] ss:$28 sps:$4 sm:$0xff]   ;;  %v4538_v24 = vld [vmem:[#allocation2 + $0x120] ss:$28 sps:$4 sm:$0xff]  }
 0x555   :  { %v4532_v31 = vld [vmem:[#allocation2 + $0xb0] ss:$28 sps:$4 sm:$0xff]   ;;  %v4535_v17 = vld [vmem:[#allocation2 + $0xe8] ss:$28 sps:$4 sm:$0xff]  }
 0x556   :  { %v2429_v10 = vadd.f32 %v2423_v19, %v2411_v11  ;;  %v4546_v11 = vld [vmem:[#allocation2 + $0x194] ss:$28 sps:$4 sm:$0xff]   ;;  %v4549_v35 = vld [vmem:[#allocation2 + $0x1cc] ss:$28 sps:$4 sm:$0xff]  }
 0x557   :  { %v4544_v47 = vld [vmem:[#allocation2 + $0x190] ss:$28 sps:$4 sm:$0xff]   ;;  %v4547_v19 = vld [vmem:[#allocation2 + $0x1c8] ss:$28 sps:$4 sm:$0xff]  }
 0x558   :  { %v2463_v37 = vpack.c.bf16 %v2429_v10, %v2428_v16  ;;  %v4552_v16 = vld [vmem:[#allocation2 + $0x204] ss:$28 sps:$4 sm:$0xff]   ;;  %v4555_v10 = vld [vmem:[#allocation2 + $0x23c] ss:$28 sps:$4 sm:$0xff]  }
 0x55a   :  { %4177 = vmatpush3.bf16.msra.mxu0 %v2463_v37  ;;  %v4558_v37 = vld [vmem:[#allocation2 + $0x274] ss:$28 sps:$4 sm:$0xff]  }
 0x55b   :  { %3245 = vmatprep.subr.bf16.mxu0 %v4477_v33  ;;  %v4553_v33 = vld [vmem:[#allocation2 + $0x238] ss:$28 sps:$4 sm:$0xff]  }
 0x55d   :  { %4179 = vmatmul.mubr.msk.bf16.vlgmr.msra.gmra.mrb[36].mxu0 %vm2464_vm10, %v2460_v38  ;;  %v4556_v38 = vld [vmem:[#allocation2 + $0x270] ss:$28 sps:$4 sm:$0xff]  }
 0x55e   :  { %3246 = vmatpush1.bf16.msra.mxu0 %v4475_v4  ;;  %v4561_v4 = vld [vmem:[#allocation2 + $0x2ac] ss:$28 sps:$4 sm:$0xff]  }
 0x55f   :  { %3247 = vmatprep.subr.bf16.mxu0 %v4480_v34  ;;  %v4559_v34 = vld [vmem:[#allocation2 + $0x2a8] ss:$28 sps:$4 sm:$0xff]  }
 0x562   :  { %3248 = vmatpush1.bf16.msra.mxu0 %v4478_v39  ;;  %v4564_v39 = vld [vmem:[#allocation2 + $0x2e4] ss:$28 sps:$4 sm:$0xff]  }
 0x563   :  { %3249 = vmatprep.subr.bf16.mxu0 %v4483_v53  ;;  %v4562_v53 = vld [vmem:[#allocation2 + $0x2e0] ss:$28 sps:$4 sm:$0xff]  }
 0x566   :  { %3250 = vmatpush1.bf16.msra.mxu0 %v4481_v1  ;;  %v4567_v1 = vld [vmem:[#allocation2 + $0x31c] ss:$28 sps:$4 sm:$0xff]  }
 0x567   :  { %3251 = vmatprep.subr.bf16.mxu0 %v4486_v57  ;;  %v4565_v57 = vld [vmem:[#allocation2 + $0x318] ss:$28 sps:$4 sm:$0xff]  }
 0x56a   :  { %3252 = vmatpush1.bf16.msra.mxu0 %v4484_v46  ;;  %v4570_v46 = vld [vmem:[#allocation2 + $0x354] ss:$28 sps:$4 sm:$0xff]  }
 0x56b   :  { %3253 = vmatprep.subr.bf16.mxu0 %v4489_v48  ;;  %v4568_v48 = vld [vmem:[#allocation2 + $0x350] ss:$28 sps:$4 sm:$0xff]  }
 0x56e   :  { %3254 = vmatpush1.bf16.msra.mxu0 %v4487_v54  ;;  %v4573_v54 = vld [vmem:[#allocation2 + $0x14] ss:$28 sps:$4 sm:$0xff]  }
 0x56f   :  { %3255 = vmatprep.subr.bf16.mxu0 %v4492_v41  ;;  %v4571_v41 = vld [vmem:[#allocation2 + $0x10] ss:$28 sps:$4 sm:$0xff]  }
 0x572   :  { %3256 = vmatpush1.bf16.msra.mxu0 %v4490_v42  ;;  %v4576_v42 = vld [vmem:[#allocation2 + $0x4c] ss:$28 sps:$4 sm:$0xff]  }
 0x573   :  { %3257 = vmatprep.subr.bf16.mxu0 %v4495_v52  ;;  %v4574_v52 = vld [vmem:[#allocation2 + $0x48] ss:$28 sps:$4 sm:$0xff]  }
 0x576   :  { %3258 = vmatpush1.bf16.msra.mxu0 %v4493_v6  ;;  %v4579_v6 = vld [vmem:[#allocation2 + $0x84] ss:$28 sps:$4 sm:$0xff]  }
 0x577   :  { %3259 = vmatprep.subr.bf16.mxu0 %v4498_v58  ;;  %v4577_v58 = vld [vmem:[#allocation2 + $0x80] ss:$28 sps:$4 sm:$0xff]  }
 0x57a   :  { %3260 = vmatpush1.bf16.msra.mxu0 %v4496_v22  ;;  %v4582_v22 = vld [vmem:[#allocation2 + $0xbc] ss:$28 sps:$4 sm:$0xff]  }
 0x57b   :  { %3261 = vmatprep.subr.bf16.mxu0 %v4501_v59  ;;  %v4580_v59 = vld [vmem:[#allocation2 + $0xb8] ss:$28 sps:$4 sm:$0xff]  }
 0x57e   :  { %3262 = vmatpush1.bf16.msra.mxu0 %v4499_v18  ;;  %v4585_v18 = vld [vmem:[#allocation2 + $0xf4] ss:$28 sps:$4 sm:$0xff]  }
 0x57f   :  { %3263 = vmatprep.subr.bf16.mxu0 %v4504_v49  ;;  %v4583_v49 = vld [vmem:[#allocation2 + $0xf0] ss:$28 sps:$4 sm:$0xff]  }
 0x582   :  { %3264 = vmatpush1.bf16.msra.mxu0 %v4502_v27  ;;  %v4588_v27 = vld [vmem:[#allocation2 + $0x12c] ss:$28 sps:$4 sm:$0xff]  }
 0x583   :  { %3265 = vmatprep.subr.bf16.mxu0 %v4507_v29  ;;  %v4586_v29 = vld [vmem:[#allocation2 + $0x128] ss:$28 sps:$4 sm:$0xff]  }
 0x586   :  { %3266 = vmatpush1.bf16.msra.mxu0 %v4505_v40  ;;  %v4591_v40 = vld [vmem:[#allocation2 + $0x164] ss:$28 sps:$4 sm:$0xff]  }
 0x587   :  { %3267 = vmatprep.subr.bf16.mxu0 %v4510_v50  ;;  %v4589_v50 = vld [vmem:[#allocation2 + $0x160] ss:$28 sps:$4 sm:$0xff]  }
 0x58a   :  { %3268 = vmatpush1.bf16.msra.mxu0 %v4508_v56  ;;  %v4594_v56 = vld [vmem:[#allocation2 + $0x19c] ss:$28 sps:$4 sm:$0xff]  }
 0x58b   :  { %3269 = vmatprep.subr.bf16.mxu0 %v4513_v32  ;;  %v4592_v32 = vld [vmem:[#allocation2 + $0x198] ss:$28 sps:$4 sm:$0xff]  }
 0x58e   :  { %3270 = vmatpush1.bf16.msra.mxu0 %v4511_v60  ;;  %v4597_v60 = vld [vmem:[#allocation2 + $0x1d4] ss:$28 sps:$4 sm:$0xff]  }
 0x58f   :  { %3271 = vmatprep.subr.bf16.mxu0 %v4516_v63  ;;  %v4595_v63 = vld [vmem:[#allocation2 + $0x1d0] ss:$28 sps:$4 sm:$0xff]  }
 0x592   :  { %3272 = vmatpush1.bf16.msra.mxu0 %v4514_v36  ;;  %v4600_v36 = vld [vmem:[#allocation2 + $0x20c] ss:$28 sps:$4 sm:$0xff]  }
 0x593   :  { %3273 = vmatprep.subr.bf16.mxu0 %v4519_v12  ;;  %v4598_v12 = vld [vmem:[#allocation2 + $0x208] ss:$28 sps:$4 sm:$0xff]  }
 0x596   :  { %3274 = vmatpush1.bf16.msra.mxu0 %v4517_v13  ;;  %v4603_v13 = vld [vmem:[#allocation2 + $0x244] ss:$28 sps:$4 sm:$0xff]  }
 0x597   :  { %3275 = vmatprep.subr.bf16.mxu0 %v4522_v43  ;;  %v4601_v43 = vld [vmem:[#allocation2 + $0x240] ss:$28 sps:$4 sm:$0xff]  }
 0x59a   :  { %3276 = vmatpush1.bf16.msra.mxu0 %v4520_v2  ;;  %v4606_v2 = vld [vmem:[#allocation2 + $0x27c] ss:$28 sps:$4 sm:$0xff]  }
 0x59b   :  { %3286 = vmatprep.subr.bf16.mxu0 %v4525_v3  ;;  %v4604_v3 = vld [vmem:[#allocation2 + $0x278] ss:$28 sps:$4 sm:$0xff]  }
 0x630   :  { %v2502_v20 = vpop.f32.mrb[36].mxu0 }
 0x631   :  { %v2509_v5 = vrot.slane %v2502_v20, 2  ;;  %v4180_v8 = vpop.f32.mrb[37].mxu0  ;;  %v5615_v25 = vpack.c.bf16 %v2502_v20, %v2502_v20  ;;  %v4609_v20 = vld [vmem:[#allocation2 + $0x2b4] ss:$28 sps:$4 sm:$0xff]  }
 0x632   :  { %v2505_v9 = vpop.f32.mrb[38].mxu0  ;;  %v4612_v8 = vld [vmem:[#allocation2 + $0x2ec] ss:$28 sps:$4 sm:$0xff]  }
 0x633   :  { %v5613_v15 = vpack.c.bf16 %v2509_v5, %v2509_v5  ;;  %v4181_v21 = vpop.f32.mrb[39].mxu0  ;;  %v4607_v5 = vld [vmem:[#allocation2 + $0x2b0] ss:$28 sps:$4 sm:$0xff]   ;;  %v4610_v9 = vld [vmem:[#allocation2 + $0x2e8] ss:$28 sps:$4 sm:$0xff]  }
 0x634   :  { %v4615_v21 = vld [vmem:[#allocation2 + $0x324] ss:$28 sps:$4 sm:$0xff]  }
 0x635   :  { %3277 = vmatprep.mubr.bf16.mxu0 %v5613_v15 }
 0x636   :  { %3278 = vmatmul.mubr.bf16.vlgmr.msra.gmra.mrb[40].mxu0 %v5615_v25 }
 0x637   :  { %3287 = vmatpush1.bf16.msra.mxu0 %v4523_v23  ;;  %3318 = vmatprep.mubr.bf16.mxu0 %v5613_v15  ;;  %v4613_v23 = vld [vmem:[#allocation2 + $0x320] ss:$28 sps:$4 sm:$0xff]  }
 0x638   :  { %3288 = vmatprep.subr.bf16.mxu0 %v4528_v55  ;;  %v4618_v55 = vld [vmem:[#allocation2 + $0x35c] ss:$28 sps:$4 sm:$0xff]  }
 0x63b   :  { %3289 = vmatpush1.bf16.msra.mxu0 %v4526_v51  ;;  %v4616_v51 = vld [vmem:[#allocation2 + $0x358] ss:$28 sps:$4 sm:$0xff]  }
 0x63c   :  { %3290 = vmatprep.subr.bf16.mxu0 %v4531_v62  ;;  %v4619_v62 = vld [vmem:[#allocation2 + $0x1d8] ss:$28 sps:$4 sm:$0xff]  }
 0x63f   :  { %3291 = vmatpush1.bf16.msra.mxu0 %v4529_v7  ;;  %v4620_v7 = vld [vmem:[#allocation2 + $0x18] ss:$28 sps:$4 sm:$0xff]  }
 0x640   :  { %3292 = vmatprep.subr.bf16.mxu0 %v4534_v45  ;;  %v4621_v45 = vld [vmem:[#allocation2 + $0x210] ss:$28 sps:$4 sm:$0xff]  }
 0x643   :  { %3293 = vmatpush1.bf16.msra.mxu0 %v4532_v31  ;;  %v4622_v31 = vld [vmem:[#allocation2 + $0x50] ss:$28 sps:$4 sm:$0xff]  }
 0x644   :  { %3294 = vmatprep.subr.bf16.mxu0 %v4537_v44  ;;  %v4623_v44 = vld [vmem:[#allocation2 + $0x248] ss:$28 sps:$4 sm:$0xff]  }
 0x647   :  { %3295 = vmatpush1.bf16.msra.mxu0 %v4535_v17  ;;  %v4624_v17 = vld [vmem:[#allocation2 + $0x88] ss:$28 sps:$4 sm:$0xff]  }
 0x648   :  { %3296 = vmatprep.subr.bf16.mxu0 %v4540_v26  ;;  %v4625_v26 = vld [vmem:[#allocation2 + $0x280] ss:$28 sps:$4 sm:$0xff]  }
 0x64b   :  { %3297 = vmatpush1.bf16.msra.mxu0 %v4538_v24  ;;  %v4626_v24 = vld [vmem:[#allocation2 + $0xc0] ss:$28 sps:$4 sm:$0xff]  }
 0x64c   :  { %3298 = vmatprep.subr.bf16.mxu0 %v4543_v61  ;;  %v4627_v61 = vld [vmem:[#allocation2 + $0x2b8] ss:$28 sps:$4 sm:$0xff]  }
 0x64f   :  { %3299 = vmatpush1.bf16.msra.mxu0 %v4541_v28  ;;  %v4628_v28 = vld [vmem:[#allocation2 + $0xf8] ss:$28 sps:$4 sm:$0xff]  }
 0x650   :  { %3300 = vmatprep.subr.bf16.mxu0 %v4546_v11  ;;  %v4629_v11 = vld [vmem:[#allocation2 + $0x2f0] ss:$28 sps:$4 sm:$0xff]  }
 0x653   :  { %3301 = vmatpush1.bf16.msra.mxu0 %v4544_v47  ;;  %v4630_v47 = vld [vmem:[#allocation2 + $0x130] ss:$28 sps:$4 sm:$0xff]  }
 0x654   :  { %3302 = vmatprep.subr.bf16.mxu0 %v4549_v35  ;;  %v4631_v35 = vld [vmem:[#allocation2 + $0x328] ss:$28 sps:$4 sm:$0xff]  }
 0x657   :  { %3303 = vmatpush1.bf16.msra.mxu0 %v4547_v19  ;;  %v4633_v19 = vld [vmem:[#allocation2 + $0x360] ss:$28 sps:$4 sm:$0xff]  }
 0x658   :  { %3304 = vmatprep.subr.bf16.mxu0 %v4552_v16  ;;  %v4634_v16 = vld [vmem:[#allocation2 + $0x1a0] ss:$28 sps:$4 sm:$0xff]  }
 0x65b   :  { %3305 = vmatpush1.bf16.msra.mxu0 %v4550_v30  ;;  %v2643_v30 = vsub.s32 3, %v5364_v0 }
 0x65c   :  { %3306 = vmatprep.subr.bf16.mxu0 %v4555_v10  ;;  %v4689_v10 = vld [vmem:[%s5656_s4] sm:$0xff] }
 0x65f   :  { %3307 = vmatpush1.bf16.msra.mxu0 %v4553_v33  ;;  %v2644_v33 = vrot.slane %v4689_v10, %v2643_v30 }
 0x660   :  { %3308 = vmatprep.subr.bf16.mxu0 %v4558_v37  ;;  %v2648_v37 = vrot.slane %v5527_v14, %v2643_v30 }
 0x663   :  { %3309 = vmatpush1.bf16.msra.mxu0 %v4556_v38 }
 0x664   :  { %3310 = vmatprep.subr.bf16.mxu0 %v4561_v4 }
 0x667   :  { %3311 = vmatpush1.bf16.msra.mxu0 %v4559_v34 }
 0x668   :  { %3312 = vmatprep.subr.bf16.mxu0 %v4564_v39 }
 0x66b   :  { %3313 = vmatpush1.bf16.msra.mxu0 %v4562_v53 }
 0x66c   :  { %3314 = vmatprep.subr.bf16.mxu0 %v4567_v1 }
 0x66f   :  { %3315 = vmatpush1.bf16.msra.mxu0 %v4565_v57 }
 0x670   :  { %3316 = vmatprep.subr.bf16.mxu0 %v4570_v46  ;;  %v4731_v46 = vmov 1983009808  }
 0x673   :  { %3317 = vmatpush1.bf16.msra.mxu0 %v4568_v48  ;;  %v3418_v48 = vunpack.c.l.s4 %v4731_v46 }
 0x674   :  { %3327 = vmatprep.subr.bf16.mxu0 %v4573_v54  ;;  %v108_v54 = vld [vmem:[%s5656_s4 + $0x18] sm:$0xff] }
 0x675   :  { %v2656_v14 = vrot.slane %v108_v54, %v2643_v30 }
 0x676   :  { %3319 = vmatmul.mubr.bf16.vlgmr.msra.gmra.mrb[44].mxu0 %v5615_v25 }
 0x677   :  { %3328 = vmatpush1.bf16.msra.mxu0 %v4571_v41  ;;  %3359 = vmatprep.mubr.bf16.mxu0 %v5613_v15 }
 0x678   :  { %3329 = vmatprep.subr.bf16.mxu0 %v4576_v42  ;;  %v3419_v42 = vunpack.c.0.s8 %v3418_v48 }
 0x67b   :  { %3330 = vmatpush1.bf16.msra.mxu0 %v4574_v52 }
 0x67c   :  { %3331 = vmatprep.subr.bf16.mxu0 %v4579_v6 }
 0x67f   :  { %3332 = vmatpush1.bf16.msra.mxu0 %v4577_v58 }
 0x680   :  { %3333 = vmatprep.subr.bf16.mxu0 %v4582_v22  ;;  %v3422_v22 = vsub.s32 %v3419_v42, %v5364_v0 }
 0x683   :  { %3334 = vmatpush1.bf16.msra.mxu0 %v4580_v59 }
 0x684   :  { %3335 = vmatprep.subr.bf16.mxu0 %v4585_v18 }
 0x687   :  { %3336 = vmatpush1.bf16.msra.mxu0 %v4583_v49 }
 0x688   :  { %3337 = vmatprep.subr.bf16.mxu0 %v4588_v27 }
 0x68b   :  { %3338 = vmatpush1.bf16.msra.mxu0 %v4586_v29 }
 0x68c   :  { %3339 = vmatprep.subr.bf16.mxu0 %v4591_v40 }
 0x68f   :  { %3340 = vmatpush1.bf16.msra.mxu0 %v4589_v50 }
 0x690   :  { %3341 = vmatprep.subr.bf16.mxu0 %v4594_v56  ;;  %v109_v56 = vld [vmem:[%s5656_s4 + $0x20] sm:$0xff] }
 0x691   :  { %v2660_v0 = vrot.slane %v109_v56, %v2643_v30 }
 0x693   :  { %3342 = vmatpush1.bf16.msra.mxu0 %v4592_v32  ;;  %v110_v32 = vld [vmem:[%s5656_s4 + $0x28] sm:$0xff] }
 0x694   :  { %3343 = vmatprep.subr.bf16.mxu0 %v4597_v60  ;;  %v2664_v60 = vrot.slane %v110_v32, %v2643_v30 }
 0x697   :  { %3344 = vmatpush1.bf16.msra.mxu0 %v4595_v63 }
 0x698   :  { %3345 = vmatprep.subr.bf16.mxu0 %v4600_v36 }
 0x69b   :  { %3346 = vmatpush1.bf16.msra.mxu0 %v4598_v12 }
 0x69c   :  { %3347 = vmatprep.subr.bf16.mxu0 %v4603_v13 }
 0x69f   :  { %3348 = vmatpush1.bf16.msra.mxu0 %v4601_v43 }
 0x6a0   :  { %3349 = vmatprep.subr.bf16.mxu0 %v4606_v2 }
 0x6a3   :  { %3350 = vmatpush1.bf16.msra.mxu0 %v4604_v3 }
 0x6a4   :  { %3351 = vmatprep.subr.bf16.mxu0 %v4609_v20  ;;  %v111_v20 = vld [vmem:[%s5656_s4 + $0x30] sm:$0xff] }
 0x6a7   :  { %3352 = vmatpush1.bf16.msra.mxu0 %v4607_v5 }
 0x6a8   :  { %3353 = vmatprep.subr.bf16.mxu0 %v4612_v8  ;;  %v2668_v8 = vrot.slane %v111_v20, %v2643_v30 }
 0x6ab   :  { %3354 = vmatpush1.bf16.msra.mxu0 %v4610_v9 }
 0x6ac   :  { %3355 = vmatprep.subr.bf16.mxu0 %v4615_v21 }
 0x6af   :  { %3356 = vmatpush1.bf16.msra.mxu0 %v4613_v23 }
 0x6b0   :  { %3357 = vmatprep.subr.bf16.mxu0 %v4618_v55 }
 0x6b3   :  { %3358 = vmatpush1.bf16.msra.mxu0 %v4616_v51 }
 0x6b4   :  { %3920 = vmatprep.subr.bf16.mxu0 %v4619_v62 }
 0x6b6   :  { %3360 = vmatmul.mubr.bf16.vlgmr.msra.gmra.mrb[48].mxu0 %v5615_v25 }
 0x6b7   :  { %3921 = vmatpush3.bf16.msra.mxu0 %v4620_v7  ;;  %3400 = vmatprep.mubr.bf16.mxu0 %v5613_v15  ;;  %v4632_v15 = vld [vmem:[#allocation2 + $0x168] ss:$28 sps:$4 sm:$0xff]  }
 0x6b8   :  { %3922 = vmatprep.subr.bf16.mxu0 %v4621_v45 }
 0x6bb   :  { %3923 = vmatpush3.bf16.msra.mxu0 %v4622_v31 }
 0x6bc   :  { %3924 = vmatprep.subr.bf16.mxu0 %v4623_v44 }
 0x6bf   :  { %3925 = vmatpush3.bf16.msra.mxu0 %v4624_v17 }
 0x6c0   :  { %3926 = vmatprep.subr.bf16.mxu0 %v4625_v26 }
 0x6c3   :  { %3927 = vmatpush3.bf16.msra.mxu0 %v4626_v24 }
 0x6c4   :  { %3928 = vmatprep.subr.bf16.mxu0 %v4627_v61 }
 0x6c7   :  { %3929 = vmatpush3.bf16.msra.mxu0 %v4628_v28 }
 0x6c8   :  { %3930 = vmatprep.subr.bf16.mxu0 %v4629_v11 }
 0x6cb   :  { %3931 = vmatpush3.bf16.msra.mxu0 %v4630_v47 }
 0x6cc   :  { %3932 = vmatprep.subr.bf16.mxu0 %v4631_v35 }
 0x6cf   :  { %3933 = vmatpush3.bf16.msra.mxu0 %v4632_v15 }
 0x6d0   :  { %3934 = vmatprep.subr.bf16.mxu0 %v4633_v19 }
 0x6d3   :  { %3935 = vmatpush3.bf16.msra.mxu0 %v4634_v16 }
 0x6d6   :  { %3401 = vmatmul.mubr.bf16.vlgmr.msra.gmra.mrb[52].mxu0 %v5615_v25  ;;  %v107_v25 = vld [vmem:[%s5656_s4 + $0x10] sm:$0xff] }
 0x6d7   :  { %v2652_v41 = vrot.slane %v107_v25, %v2643_v30 }
 0x709   :  { %v3279_v38 = vpop.f32.mrb[40].mxu0 }
 0x70a   :  { %v3280_v4 = vadd.f32 %v3279_v38, %v2644_v33  ;;  %v3281_v34 = vpop.f32.mrb[41].mxu0 }
 0x70b   :  { %v3282_v39 = vadd.f32 %v3281_v34, %v2648_v37  ;;  %v3283_v53 = vpop.f32.mrb[42].mxu0 }
 0x70c   :  { %v3284_v1 = vpop.f32.mrb[43].mxu0 }
 0x70d   :  { %v3415_v57 = vcombine.low %v3280_v4, %v3282_v39 }
 0x70f   :  { %v3423_v29 = vrot.slane %v3415_v57, %v3422_v22 }
 0x749   :  { %v3320_v52 = vpop.f32.mrb[44].mxu0 }
 0x74a   :  { %v3321_v6 = vadd.f32 %v3320_v52, %v2652_v41  ;;  %v3322_v58 = vpop.f32.mrb[45].mxu0 }
 0x74b   :  { %v3323_v59 = vadd.f32 %v3322_v58, %v2656_v14  ;;  %v3324_v18 = vpop.f32.mrb[46].mxu0 }
 0x74c   :  { %v3325_v49 = vpop.f32.mrb[47].mxu0 }
 0x74d   :  { %v3416_v27 = vcombine.low %v3321_v6, %v3323_v59 }
 0x74f   :  { %v3430_v40 = vrot.slane %v3416_v27, %v3422_v22 }
 0x751   :  { %v3431_v50 = vcombine.low %v3423_v29, %v3430_v40 }
 0x753   :  { %3450 = vst [vmem:[%s5657_s5] sm:$0xff] %v3431_v50 }
 0x789   :  { %v3361_v63 = vpop.f32.mrb[48].mxu0 }
 0x78a   :  { %v3362_v36 = vadd.f32 %v3361_v63, %v2660_v0  ;;  %v3363_v12 = vpop.f32.mrb[49].mxu0 }
 0x78b   :  { %v3364_v13 = vadd.f32 %v3363_v12, %v2664_v60  ;;  %v3365_v43 = vpop.f32.mrb[50].mxu0 }
 0x78c   :  { %v3366_v2 = vpop.f32.mrb[51].mxu0 }
 0x78d   :  { %v3432_v3 = vcombine.low %v3362_v36, %v3364_v13 }
 0x78f   :  { %v3439_v62 = vrot.slane %v3432_v3, %v3422_v22 }
 0x7a9   :  { %v3936_v5 = vpop.f32.mrb[52].mxu0 }
 0x7aa   :  { %v3937_v9 = vpop.f32.mrb[53].mxu0 }
 0x7ab   :  { %v3938_v21 = vadd.f32 %v3937_v9, %v3936_v5  ;;  %v3939_v23 = vpop.f32.mrb[54].mxu0 }
 0x7ac   :  { %v3940_v55 = vpop.f32.mrb[55].mxu0 }
 0x7ad   :  { %v3403_v51 = vadd.f32 %v3938_v21, %v2668_v8 }
 0x7af   :  { %v3446_v7 = vrot.slane %v3403_v51, %v3422_v22 }
 0x7b1   :  { %v3447_v45 = vcombine.low %v3439_v62, %v3446_v7 }
 0x7b3   :  { %3451 = vst [vmem:[%s5657_s5 + $0x8] sm:$0x3f] %v3447_v45 }
 0x7b4   :  { %3456 = vsyncpa [#allocation3], 1 }

</bundles_post_ra>
